<compile_context>
chip_gen: v7x
topology: tpu7x:2x2x1
jax: 0.10.0
libtpu: 0.0.40
codegen_flags: <defaults>
</compile_context>

<pallas_src>
import functools

import jax
import jax.numpy as jnp
from jax.experimental import pallas as pl
from jax.experimental.pallas import tpu as pltpu


def _round_up(x: int, m: int) -> int:
    return (x + m - 1) // m * m


def _fasttext_kernel(ids_ref, emb_hbm, w_ref, b_ref, out_ref,
                     gather_buf, sem, acc_ref,
                     *, seq_len: int, batch_pad: int, batch_tile: int):
    """One grid step == one tile of `batch_tile` batch rows.

    ids_ref   : SMEM (seq_len * batch_pad,) int32, seq-major (scalar prefetch)
    emb_hbm   : HBM  (V, E_pad) f32   (memory_space=pl.ANY, manual DMA gather)
    w_ref     : VMEM (E_pad, O_pad) f32
    b_ref     : VMEM (1, O_pad) f32
    out_ref   : VMEM (batch_tile, O_pad) f32
    gather_buf: VMEM (2, batch_tile, E_pad) f32 scratch (double buffer)
    sem       : DMA semaphores (2, batch_tile)
    acc_ref   : VMEM (batch_tile, E_pad) f32 scratch (pooled-sum accumulator)
    """
    bt = pl.program_id(0)

    def fetch(s, slot):
        # Gather the batch_tile embedding rows for sequence position s.
        for b in range(batch_tile):               # static unroll; batch_tile is small
            tok = ids_ref[s * batch_pad + bt * batch_tile + b]
            pltpu.make_async_copy(
                emb_hbm.at[pl.ds(tok, 1), :],
                gather_buf.at[slot, pl.ds(b, 1), :],
                sem.at[slot, b],
            ).start()

    def wait(slot):
        for b in range(batch_tile):
            pltpu.make_async_copy(
                emb_hbm.at[pl.ds(0, 1), :],        # dummy src; size + sem must match
                gather_buf.at[slot, pl.ds(b, 1), :],
                sem.at[slot, b],
            ).wait()

    acc_ref[...] = jnp.zeros_like(acc_ref)
    fetch(0, 0)                                    # prime the double buffer

    @pl.loop(0, seq_len)
    def _(s):
        slot = s & 1
        wait(slot)

        @pl.when(s + 1 < seq_len)
        def _():
            fetch(s + 1, 1 - slot)                 # prefetch next position's rows

        acc_ref[...] += gather_buf[slot]           # accumulate gathered rows (f32)

    # Mean over the sequence: scale the small pooled sum once, then the FC layer
    # on the MXU; bias broadcasts over the batch rows.
    pooled = acc_ref[...] * (1.0 / seq_len)
    out = jnp.dot(pooled, w_ref[...], preferred_element_type=jnp.float32) + b_ref[...]
    out_ref[...] = out.astype(out_ref.dtype)


def fasttext_forward(text, emb_table, fc_w, fc_b, *, batch_tile: int = 8):
    """text: (S, B) int32 token ids (seq-first, like the PyTorch module).
    Returns (B, O) f32 == fc(mean_over_seq(embedding(text)))."""
    S, B = text.shape
    V, E = emb_table.shape
    O = fc_w.shape[1]

    E_pad = _round_up(E, 128)                      # lane-dense embedding dim
    O_pad = _round_up(O, 128)                      # lane-dense output dim
    B_pad = _round_up(B, batch_tile)               # sublane-dense batch

    # Zero-pad parameters once (padding rows/columns contribute exact zeros).
    emb_pad = jnp.zeros((V, E_pad), jnp.float32).at[:, :E].set(
        emb_table.astype(jnp.float32))
    w_pad = jnp.zeros((E_pad, O_pad), jnp.float32).at[:E, :O].set(
        fc_w.astype(jnp.float32))
    b_pad = jnp.zeros((1, O_pad), jnp.float32).at[0, :O].set(
        fc_b.astype(jnp.float32))

    # Token ids, flattened seq-major into a 1-D int32 SMEM scalar-prefetch array.
    ids_pad = jnp.zeros((S, B_pad), jnp.int32).at[:, :B].set(text.astype(jnp.int32))
    ids_flat = ids_pad.reshape(-1)

    kernel = functools.partial(_fasttext_kernel, seq_len=S,
                               batch_pad=B_pad, batch_tile=batch_tile)

    grid = (B_pad // batch_tile,)
    flops = 2 * B_pad * S * E_pad + 2 * B_pad * E_pad * O_pad
    bytes_accessed = (ids_flat.size * 4            # ids
                      + B_pad * S * E_pad * 4      # gathered embedding rows
                      + E_pad * O_pad * 4          # fc weight
                      + B_pad * O_pad * 4)         # output

    out_pad = pl.pallas_call(
        kernel,
        out_shape=jax.ShapeDtypeStruct((B_pad, O_pad), jnp.float32),
        grid_spec=pltpu.PrefetchScalarGridSpec(
            num_scalar_prefetch=1,                 # ids -> SMEM
            grid=grid,
            in_specs=[
                pl.BlockSpec(memory_space=pl.ANY),                     # emb table (HBM)
                pl.BlockSpec((E_pad, O_pad), lambda bt, ids: (0, 0)),  # fc weight
                pl.BlockSpec((1, O_pad), lambda bt, ids: (0, 0)),      # fc bias
            ],
            out_specs=pl.BlockSpec((batch_tile, O_pad), lambda bt, ids: (bt, 0)),
            scratch_shapes=[
                pltpu.VMEM((2, batch_tile, E_pad), jnp.float32),       # gather buffers
                pltpu.SemaphoreType.DMA((2, batch_tile)),
                pltpu.VMEM((batch_tile, E_pad), jnp.float32),          # pooled accum
            ],
        ),
        compiler_params=pltpu.CompilerParams(
            dimension_semantics=("parallel",),     # batch tiles -> both TCs on v7x
            vmem_limit_bytes=64 * 1024 * 1024,
        ),
        cost_estimate=pl.CostEstimate(flops=flops, transcendentals=0,
                                      bytes_accessed=bytes_accessed),
    )(ids_flat, emb_pad, w_pad, b_pad)

    return out_pad[:B, :O]


def fasttext_reference(text, emb_table, fc_w, fc_b):
    # Pure-JAX mirror of the PyTorch forward.
    embedded = emb_table[text]                     # (S, B, E)
    embedded = jnp.transpose(embedded, (1, 0, 2))  # (B, S, E)
    pooled = jnp.mean(embedded, axis=1)            # (B, E) == avg_pool2d + squeeze
    return pooled @ fc_w + fc_b                    # (B, O)


if __name__ == "__main__":
    # Small shapes consistent with the module (EMBEDDING_DIM=100, OUTPUT_DIM=1).
    vocab_size = 1000
    embedding_dim = 100
    output_dim = 1
    pad_idx = 1
    seq_len = 12
    batch = 16

    key = jax.random.PRNGKey(0)
    k_emb, k_w, k_b, k_txt = jax.random.split(key, 4)

    emb_table = jax.random.normal(k_emb, (vocab_size, embedding_dim), jnp.float32)
    emb_table = emb_table.at[pad_idx].set(0.0)     # nn.Embedding padding_idx row
    fc_w = jax.random.normal(k_w, (embedding_dim, output_dim), jnp.float32) * 0.1
    fc_b = jax.random.normal(k_b, (output_dim,), jnp.float32) * 0.1

    text = jax.random.randint(k_txt, (seq_len, batch), 0, vocab_size, jnp.int32)
    text = text.at[-3:, 0].set(pad_idx)            # trailing pad tokens in one sample

    out = fasttext_forward(text, emb_table, fc_w, fc_b)
    out = jax.block_until_ready(out)

    ref = fasttext_reference(text, emb_table, fc_w, fc_b)
    assert out.shape == (batch, output_dim), out.shape
    assert jnp.allclose(out, ref, atol=1e-4, rtol=1e-4), (out, ref)

    print("KERNEL_OK")
</pallas_src>

<mosaic_0001>
module attributes {stable_mosaic.version = 11 : i64} {
  func.func @_fasttext_kernel(%arg0: i32, %arg1: memref<192xi32, #tpu.memory_space<smem>>, %arg2: memref<1000x128xf32, #tpu.memory_space<any>>, %arg3: memref<128x128xf32, #tpu.memory_space<vmem>>, %arg4: memref<1x128xf32, #tpu.memory_space<vmem>>, %arg5: memref<8x128xf32, #tpu.memory_space<vmem>>, %arg6: memref<2x8x128xf32, #tpu.memory_space<vmem>>, %arg7: memref<2x8x!tpu.dma_semaphore, #tpu.memory_space<semaphore_mem>>, %arg8: memref<8x128xf32, #tpu.memory_space<vmem>>) attributes {dimension_semantics = [#tpu.dimension_semantics<parallel>], iteration_bounds = array<i64: 2>, scalar_prefetch = 1 : i64, scratch_operands = 3 : i64, tpu.core_type = #tpu.core_type<tc>, window_params = [{}, {pipeline_mode = #tpu.pipeline_mode<synchronous>, transform_indices = @transform_1, window_bounds = array<i64: 128, 128>}, {pipeline_mode = #tpu.pipeline_mode<synchronous>, transform_indices = @transform_2, window_bounds = array<i64: 1, 128>}, {transform_indices = @transform_3, window_bounds = array<i64: 8, 128>}]} {
    %cst = arith.constant 0.000000e+00 : f32
    %0 = vector.broadcast %cst : f32 to vector<8x128xf32>
    %c0 = arith.constant 0 : index
    %c0_0 = arith.constant 0 : index
    %1 = vector.load %arg8[%c0, %c0_0] : memref<8x128xf32, #tpu.memory_space<vmem>>, vector<8x128xf32>
    tpu.vector_store %arg8[%c0, %c0_0], %0 {strides = array<i32>} : memref<8x128xf32, #tpu.memory_space<vmem>>, vector<8x128xf32>,
    %c8_i32 = arith.constant 8 : i32
    %2 = arith.muli %arg0, %c8_i32 : i32
    %c0_i32 = arith.constant 0 : i32
    %3 = arith.addi %c0_i32, %2 : i32
    %c0_i32_1 = arith.constant 0 : i32
    %4 = arith.addi %3, %c0_i32_1 : i32
    %5 = arith.index_cast %4 : i32 to index
    %6 = memref.load %arg1[%5] : memref<192xi32, #tpu.memory_space<smem>>
    %c0_i32_2 = arith.constant 0 : i32
    %c0_i32_3 = arith.constant 0 : i32
    %c0_i32_4 = arith.constant 0 : i32
    %c0_i32_5 = arith.constant 0 : i32
    %7 = tpu.memref_slice %arg2[%6, %c0_i32_5] : memref<1000x128xf32, #tpu.memory_space<any>> -> memref<1x128xf32, #tpu.memory_space<any>>
    %c0_i32_6 = arith.constant 0 : i32
    %c0_i32_7 = arith.constant 0 : i32
    %8 = tpu.memref_slice %arg6[%c0_i32_2, %c0_i32_6, %c0_i32_7] : memref<2x8x128xf32, #tpu.memory_space<vmem>> -> memref<1x1x128xf32, #tpu.memory_space<vmem>>
    %9 = tpu.memref_squeeze %8 : memref<1x1x128xf32, #tpu.memory_space<vmem>> -> memref<1x128xf32, #tpu.memory_space<vmem>>
    %10 = tpu.memref_slice %arg7[%c0_i32_3, %c0_i32_4] : memref<2x8x!tpu.dma_semaphore, #tpu.memory_space<semaphore_mem>> -> memref<1x1x!tpu.dma_semaphore, #tpu.memory_space<semaphore_mem>>
    %11 = tpu.memref_squeeze %10 : memref<1x1x!tpu.dma_semaphore, #tpu.memory_space<semaphore_mem>> -> memref<!tpu.dma_semaphore, #tpu.memory_space<semaphore_mem>>
    tpu.enqueue_dma source(%7 : memref<1x128xf32, #tpu.memory_space<any>>) target(%9 : memref<1x128xf32, #tpu.memory_space<vmem>>) target_semaphore(%11 : memref<!tpu.dma_semaphore, #tpu.memory_space<semaphore_mem>>)
    %c8_i32_8 = arith.constant 8 : i32
    %12 = arith.muli %arg0, %c8_i32_8 : i32
    %c0_i32_9 = arith.constant 0 : i32
    %13 = arith.addi %c0_i32_9, %12 : i32
    %c1_i32 = arith.constant 1 : i32
    %14 = arith.addi %13, %c1_i32 : i32
    %15 = arith.index_cast %14 : i32 to index
    %16 = memref.load %arg1[%15] : memref<192xi32, #tpu.memory_space<smem>>
    %c0_i32_10 = arith.constant 0 : i32
    %c0_i32_11 = arith.constant 0 : i32
    %c1_i32_12 = arith.constant 1 : i32
    %c0_i32_13 = arith.constant 0 : i32
    %17 = tpu.memref_slice %arg2[%16, %c0_i32_13] : memref<1000x128xf32, #tpu.memory_space<any>> -> memref<1x128xf32, #tpu.memory_space<any>>
    %c1_i32_14 = arith.constant 1 : i32
    %c0_i32_15 = arith.constant 0 : i32
    %18 = tpu.memref_slice %arg6[%c0_i32_10, %c1_i32_14, %c0_i32_15] : memref<2x8x128xf32, #tpu.memory_space<vmem>> -> memref<1x1x128xf32, #tpu.memory_space<vmem>>
    %19 = tpu.memref_squeeze %18 : memref<1x1x128xf32, #tpu.memory_space<vmem>> -> memref<1x128xf32, #tpu.memory_space<vmem>>
    %20 = tpu.memref_slice %arg7[%c0_i32_11, %c1_i32_12] : memref<2x8x!tpu.dma_semaphore, #tpu.memory_space<semaphore_mem>> -> memref<1x1x!tpu.dma_semaphore, #tpu.memory_space<semaphore_mem>>
    %21 = tpu.memref_squeeze %20 : memref<1x1x!tpu.dma_semaphore, #tpu.memory_space<semaphore_mem>> -> memref<!tpu.dma_semaphore, #tpu.memory_space<semaphore_mem>>
    tpu.enqueue_dma source(%17 : memref<1x128xf32, #tpu.memory_space<any>>) target(%19 : memref<1x128xf32, #tpu.memory_space<vmem>>) target_semaphore(%21 : memref<!tpu.dma_semaphore, #tpu.memory_space<semaphore_mem>>)
    %c8_i32_16 = arith.constant 8 : i32
    %22 = arith.muli %arg0, %c8_i32_16 : i32
    %c0_i32_17 = arith.constant 0 : i32
    %23 = arith.addi %c0_i32_17, %22 : i32
    %c2_i32 = arith.constant 2 : i32
    %24 = arith.addi %23, %c2_i32 : i32
    %25 = arith.index_cast %24 : i32 to index
    %26 = memref.load %arg1[%25] : memref<192xi32, #tpu.memory_space<smem>>
    %c0_i32_18 = arith.constant 0 : i32
    %c0_i32_19 = arith.constant 0 : i32
    %c2_i32_20 = arith.constant 2 : i32
    %c0_i32_21 = arith.constant 0 : i32
    %27 = tpu.memref_slice %arg2[%26, %c0_i32_21] : memref<1000x128xf32, #tpu.memory_space<any>> -> memref<1x128xf32, #tpu.memory_space<any>>
    %c2_i32_22 = arith.constant 2 : i32
    %c0_i32_23 = arith.constant 0 : i32
    %28 = tpu.memref_slice %arg6[%c0_i32_18, %c2_i32_22, %c0_i32_23] : memref<2x8x128xf32, #tpu.memory_space<vmem>> -> memref<1x1x128xf32, #tpu.memory_space<vmem>>
    %29 = tpu.memref_squeeze %28 : memref<1x1x128xf32, #tpu.memory_space<vmem>> -> memref<1x128xf32, #tpu.memory_space<vmem>>
    %30 = tpu.memref_slice %arg7[%c0_i32_19, %c2_i32_20] : memref<2x8x!tpu.dma_semaphore, #tpu.memory_space<semaphore_mem>> -> memref<1x1x!tpu.dma_semaphore, #tpu.memory_space<semaphore_mem>>
    %31 = tpu.memref_squeeze %30 : memref<1x1x!tpu.dma_semaphore, #tpu.memory_space<semaphore_mem>> -> memref<!tpu.dma_semaphore, #tpu.memory_space<semaphore_mem>>
    tpu.enqueue_dma source(%27 : memref<1x128xf32, #tpu.memory_space<any>>) target(%29 : memref<1x128xf32, #tpu.memory_space<vmem>>) target_semaphore(%31 : memref<!tpu.dma_semaphore, #tpu.memory_space<semaphore_mem>>)
    %c8_i32_24 = arith.constant 8 : i32
    %32 = arith.muli %arg0, %c8_i32_24 : i32
    %c0_i32_25 = arith.constant 0 : i32
    %33 = arith.addi %c0_i32_25, %32 : i32
    %c3_i32 = arith.constant 3 : i32
    %34 = arith.addi %33, %c3_i32 : i32
    %35 = arith.index_cast %34 : i32 to index
    %36 = memref.load %arg1[%35] : memref<192xi32, #tpu.memory_space<smem>>
    %c0_i32_26 = arith.constant 0 : i32
    %c0_i32_27 = arith.constant 0 : i32
    %c3_i32_28 = arith.constant 3 : i32
    %c0_i32_29 = arith.constant 0 : i32
    %37 = tpu.memref_slice %arg2[%36, %c0_i32_29] : memref<1000x128xf32, #tpu.memory_space<any>> -> memref<1x128xf32, #tpu.memory_space<any>>
    %c3_i32_30 = arith.constant 3 : i32
    %c0_i32_31 = arith.constant 0 : i32
    %38 = tpu.memref_slice %arg6[%c0_i32_26, %c3_i32_30, %c0_i32_31] : memref<2x8x128xf32, #tpu.memory_space<vmem>> -> memref<1x1x128xf32, #tpu.memory_space<vmem>>
    %39 = tpu.memref_squeeze %38 : memref<1x1x128xf32, #tpu.memory_space<vmem>> -> memref<1x128xf32, #tpu.memory_space<vmem>>
    %40 = tpu.memref_slice %arg7[%c0_i32_27, %c3_i32_28] : memref<2x8x!tpu.dma_semaphore, #tpu.memory_space<semaphore_mem>> -> memref<1x1x!tpu.dma_semaphore, #tpu.memory_space<semaphore_mem>>
    %41 = tpu.memref_squeeze %40 : memref<1x1x!tpu.dma_semaphore, #tpu.memory_space<semaphore_mem>> -> memref<!tpu.dma_semaphore, #tpu.memory_space<semaphore_mem>>
    tpu.enqueue_dma source(%37 : memref<1x128xf32, #tpu.memory_space<any>>) target(%39 : memref<1x128xf32, #tpu.memory_space<vmem>>) target_semaphore(%41 : memref<!tpu.dma_semaphore, #tpu.memory_space<semaphore_mem>>)
    %c8_i32_32 = arith.constant 8 : i32
    %42 = arith.muli %arg0, %c8_i32_32 : i32
    %c0_i32_33 = arith.constant 0 : i32
    %43 = arith.addi %c0_i32_33, %42 : i32
    %c4_i32 = arith.constant 4 : i32
    %44 = arith.addi %43, %c4_i32 : i32
    %45 = arith.index_cast %44 : i32 to index
    %46 = memref.load %arg1[%45] : memref<192xi32, #tpu.memory_space<smem>>
    %c0_i32_34 = arith.constant 0 : i32
    %c0_i32_35 = arith.constant 0 : i32
    %c4_i32_36 = arith.constant 4 : i32
    %c0_i32_37 = arith.constant 0 : i32
    %47 = tpu.memref_slice %arg2[%46, %c0_i32_37] : memref<1000x128xf32, #tpu.memory_space<any>> -> memref<1x128xf32, #tpu.memory_space<any>>
    %c4_i32_38 = arith.constant 4 : i32
    %c0_i32_39 = arith.constant 0 : i32
    %48 = tpu.memref_slice %arg6[%c0_i32_34, %c4_i32_38, %c0_i32_39] : memref<2x8x128xf32, #tpu.memory_space<vmem>> -> memref<1x1x128xf32, #tpu.memory_space<vmem>>
    %49 = tpu.memref_squeeze %48 : memref<1x1x128xf32, #tpu.memory_space<vmem>> -> memref<1x128xf32, #tpu.memory_space<vmem>>
    %50 = tpu.memref_slice %arg7[%c0_i32_35, %c4_i32_36] : memref<2x8x!tpu.dma_semaphore, #tpu.memory_space<semaphore_mem>> -> memref<1x1x!tpu.dma_semaphore, #tpu.memory_space<semaphore_mem>>
    %51 = tpu.memref_squeeze %50 : memref<1x1x!tpu.dma_semaphore, #tpu.memory_space<semaphore_mem>> -> memref<!tpu.dma_semaphore, #tpu.memory_space<semaphore_mem>>
    tpu.enqueue_dma source(%47 : memref<1x128xf32, #tpu.memory_space<any>>) target(%49 : memref<1x128xf32, #tpu.memory_space<vmem>>) target_semaphore(%51 : memref<!tpu.dma_semaphore, #tpu.memory_space<semaphore_mem>>)
    %c8_i32_40 = arith.constant 8 : i32
    %52 = arith.muli %arg0, %c8_i32_40 : i32
    %c0_i32_41 = arith.constant 0 : i32
    %53 = arith.addi %c0_i32_41, %52 : i32
    %c5_i32 = arith.constant 5 : i32
    %54 = arith.addi %53, %c5_i32 : i32
    %55 = arith.index_cast %54 : i32 to index
    %56 = memref.load %arg1[%55] : memref<192xi32, #tpu.memory_space<smem>>
    %c0_i32_42 = arith.constant 0 : i32
    %c0_i32_43 = arith.constant 0 : i32
    %c5_i32_44 = arith.constant 5 : i32
    %c0_i32_45 = arith.constant 0 : i32
    %57 = tpu.memref_slice %arg2[%56, %c0_i32_45] : memref<1000x128xf32, #tpu.memory_space<any>> -> memref<1x128xf32, #tpu.memory_space<any>>
    %c5_i32_46 = arith.constant 5 : i32
    %c0_i32_47 = arith.constant 0 : i32
    %58 = tpu.memref_slice %arg6[%c0_i32_42, %c5_i32_46, %c0_i32_47] : memref<2x8x128xf32, #tpu.memory_space<vmem>> -> memref<1x1x128xf32, #tpu.memory_space<vmem>>
    %59 = tpu.memref_squeeze %58 : memref<1x1x128xf32, #tpu.memory_space<vmem>> -> memref<1x128xf32, #tpu.memory_space<vmem>>
    %60 = tpu.memref_slice %arg7[%c0_i32_43, %c5_i32_44] : memref<2x8x!tpu.dma_semaphore, #tpu.memory_space<semaphore_mem>> -> memref<1x1x!tpu.dma_semaphore, #tpu.memory_space<semaphore_mem>>
    %61 = tpu.memref_squeeze %60 : memref<1x1x!tpu.dma_semaphore, #tpu.memory_space<semaphore_mem>> -> memref<!tpu.dma_semaphore, #tpu.memory_space<semaphore_mem>>
    tpu.enqueue_dma source(%57 : memref<1x128xf32, #tpu.memory_space<any>>) target(%59 : memref<1x128xf32, #tpu.memory_space<vmem>>) target_semaphore(%61 : memref<!tpu.dma_semaphore, #tpu.memory_space<semaphore_mem>>)
    %c8_i32_48 = arith.constant 8 : i32
    %62 = arith.muli %arg0, %c8_i32_48 : i32
    %c0_i32_49 = arith.constant 0 : i32
    %63 = arith.addi %c0_i32_49, %62 : i32
    %c6_i32 = arith.constant 6 : i32
    %64 = arith.addi %63, %c6_i32 : i32
    %65 = arith.index_cast %64 : i32 to index
    %66 = memref.load %arg1[%65] : memref<192xi32, #tpu.memory_space<smem>>
    %c0_i32_50 = arith.constant 0 : i32
    %c0_i32_51 = arith.constant 0 : i32
    %c6_i32_52 = arith.constant 6 : i32
    %c0_i32_53 = arith.constant 0 : i32
    %67 = tpu.memref_slice %arg2[%66, %c0_i32_53] : memref<1000x128xf32, #tpu.memory_space<any>> -> memref<1x128xf32, #tpu.memory_space<any>>
    %c6_i32_54 = arith.constant 6 : i32
    %c0_i32_55 = arith.constant 0 : i32
    %68 = tpu.memref_slice %arg6[%c0_i32_50, %c6_i32_54, %c0_i32_55] : memref<2x8x128xf32, #tpu.memory_space<vmem>> -> memref<1x1x128xf32, #tpu.memory_space<vmem>>
    %69 = tpu.memref_squeeze %68 : memref<1x1x128xf32, #tpu.memory_space<vmem>> -> memref<1x128xf32, #tpu.memory_space<vmem>>
    %70 = tpu.memref_slice %arg7[%c0_i32_51, %c6_i32_52] : memref<2x8x!tpu.dma_semaphore, #tpu.memory_space<semaphore_mem>> -> memref<1x1x!tpu.dma_semaphore, #tpu.memory_space<semaphore_mem>>
    %71 = tpu.memref_squeeze %70 : memref<1x1x!tpu.dma_semaphore, #tpu.memory_space<semaphore_mem>> -> memref<!tpu.dma_semaphore, #tpu.memory_space<semaphore_mem>>
    tpu.enqueue_dma source(%67 : memref<1x128xf32, #tpu.memory_space<any>>) target(%69 : memref<1x128xf32, #tpu.memory_space<vmem>>) target_semaphore(%71 : memref<!tpu.dma_semaphore, #tpu.memory_space<semaphore_mem>>)
    %c8_i32_56 = arith.constant 8 : i32
    %72 = arith.muli %arg0, %c8_i32_56 : i32
    %c0_i32_57 = arith.constant 0 : i32
    %73 = arith.addi %c0_i32_57, %72 : i32
    %c7_i32 = arith.constant 7 : i32
    %74 = arith.addi %73, %c7_i32 : i32
    %75 = arith.index_cast %74 : i32 to index
    %76 = memref.load %arg1[%75] : memref<192xi32, #tpu.memory_space<smem>>
    %c0_i32_58 = arith.constant 0 : i32
    %c0_i32_59 = arith.constant 0 : i32
    %c7_i32_60 = arith.constant 7 : i32
    %c0_i32_61 = arith.constant 0 : i32
    %77 = tpu.memref_slice %arg2[%76, %c0_i32_61] : memref<1000x128xf32, #tpu.memory_space<any>> -> memref<1x128xf32, #tpu.memory_space<any>>
    %c7_i32_62 = arith.constant 7 : i32
    %c0_i32_63 = arith.constant 0 : i32
    %78 = tpu.memref_slice %arg6[%c0_i32_58, %c7_i32_62, %c0_i32_63] : memref<2x8x128xf32, #tpu.memory_space<vmem>> -> memref<1x1x128xf32, #tpu.memory_space<vmem>>
    %79 = tpu.memref_squeeze %78 : memref<1x1x128xf32, #tpu.memory_space<vmem>> -> memref<1x128xf32, #tpu.memory_space<vmem>>
    %80 = tpu.memref_slice %arg7[%c0_i32_59, %c7_i32_60] : memref<2x8x!tpu.dma_semaphore, #tpu.memory_space<semaphore_mem>> -> memref<1x1x!tpu.dma_semaphore, #tpu.memory_space<semaphore_mem>>
    %81 = tpu.memref_squeeze %80 : memref<1x1x!tpu.dma_semaphore, #tpu.memory_space<semaphore_mem>> -> memref<!tpu.dma_semaphore, #tpu.memory_space<semaphore_mem>>
    tpu.enqueue_dma source(%77 : memref<1x128xf32, #tpu.memory_space<any>>) target(%79 : memref<1x128xf32, #tpu.memory_space<vmem>>) target_semaphore(%81 : memref<!tpu.dma_semaphore, #tpu.memory_space<semaphore_mem>>)
    %c0_i32_64 = arith.constant 0 : i32
    %c12_i32 = arith.constant 12 : i32
    %82 = arith.addi %c0_i32_64, %c12_i32 : i32
    %c1_i32_65 = arith.constant 1 : i32
    scf.for %arg9 = %c0_i32_64 to %82 step %c1_i32_65  : i32 {
      %c1_i32_77 = arith.constant 1 : i32
      %92 = arith.muli %arg9, %c1_i32_77 : i32
      %c0_i32_78 = arith.constant 0 : i32
      %93 = arith.addi %c0_i32_78, %92 : i32
      %c1_i32_79 = arith.constant 1 : i32
      %94 = arith.andi %93, %c1_i32_79 : i32
      %c0_i32_80 = arith.constant 0 : i32
      %c0_i32_81 = arith.constant 0 : i32
      %c0_i32_82 = arith.constant 0 : i32
      %95 = tpu.memref_slice %arg2[%c0_i32_81, %c0_i32_82] : memref<1000x128xf32, #tpu.memory_space<any>> -> memref<1x128xf32, #tpu.memory_space<any>>
      %c0_i32_83 = arith.constant 0 : i32
      %c0_i32_84 = arith.constant 0 : i32
      %96 = tpu.memref_slice %arg6[%94, %c0_i32_83, %c0_i32_84] : memref<2x8x128xf32, #tpu.memory_space<vmem>> -> memref<1x1x128xf32, #tpu.memory_space<vmem>>
      %97 = tpu.memref_squeeze %96 : memref<1x1x128xf32, #tpu.memory_space<vmem>> -> memref<1x128xf32, #tpu.memory_space<vmem>>
      %98 = tpu.memref_slice %arg7[%94, %c0_i32_80] : memref<2x8x!tpu.dma_semaphore, #tpu.memory_space<semaphore_mem>> -> memref<1x1x!tpu.dma_semaphore, #tpu.memory_space<semaphore_mem>>
      %99 = tpu.memref_squeeze %98 : memref<1x1x!tpu.dma_semaphore, #tpu.memory_space<semaphore_mem>> -> memref<!tpu.dma_semaphore, #tpu.memory_space<semaphore_mem>>
      tpu.wait_dma2 semaphore(%99 : memref<!tpu.dma_semaphore, #tpu.memory_space<semaphore_mem>>) src(%95 : memref<1x128xf32, #tpu.memory_space<any>>) dst(%97 : memref<1x128xf32, #tpu.memory_space<vmem>>)
      %c1_i32_85 = arith.constant 1 : i32
      %c0_i32_86 = arith.constant 0 : i32
      %c0_i32_87 = arith.constant 0 : i32
      %100 = tpu.memref_slice %arg2[%c0_i32_86, %c0_i32_87] : memref<1000x128xf32, #tpu.memory_space<any>> -> memref<1x128xf32, #tpu.memory_space<any>>
      %c1_i32_88 = arith.constant 1 : i32
      %c0_i32_89 = arith.constant 0 : i32
      %101 = tpu.memref_slice %arg6[%94, %c1_i32_88, %c0_i32_89] : memref<2x8x128xf32, #tpu.memory_space<vmem>> -> memref<1x1x128xf32, #tpu.memory_space<vmem>>
      %102 = tpu.memref_squeeze %101 : memref<1x1x128xf32, #tpu.memory_space<vmem>> -> memref<1x128xf32, #tpu.memory_space<vmem>>
      %103 = tpu.memref_slice %arg7[%94, %c1_i32_85] : memref<2x8x!tpu.dma_semaphore, #tpu.memory_space<semaphore_mem>> -> memref<1x1x!tpu.dma_semaphore, #tpu.memory_space<semaphore_mem>>
      %104 = tpu.memref_squeeze %103 : memref<1x1x!tpu.dma_semaphore, #tpu.memory_space<semaphore_mem>> -> memref<!tpu.dma_semaphore, #tpu.memory_space<semaphore_mem>>
      tpu.wait_dma2 semaphore(%104 : memref<!tpu.dma_semaphore, #tpu.memory_space<semaphore_mem>>) src(%100 : memref<1x128xf32, #tpu.memory_space<any>>) dst(%102 : memref<1x128xf32, #tpu.memory_space<vmem>>)
      %c2_i32_90 = arith.constant 2 : i32
      %c0_i32_91 = arith.constant 0 : i32
      %c0_i32_92 = arith.constant 0 : i32
      %105 = tpu.memref_slice %arg2[%c0_i32_91, %c0_i32_92] : memref<1000x128xf32, #tpu.memory_space<any>> -> memref<1x128xf32, #tpu.memory_space<any>>
      %c2_i32_93 = arith.constant 2 : i32
      %c0_i32_94 = arith.constant 0 : i32
      %106 = tpu.memref_slice %arg6[%94, %c2_i32_93, %c0_i32_94] : memref<2x8x128xf32, #tpu.memory_space<vmem>> -> memref<1x1x128xf32, #tpu.memory_space<vmem>>
      %107 = tpu.memref_squeeze %106 : memref<1x1x128xf32, #tpu.memory_space<vmem>> -> memref<1x128xf32, #tpu.memory_space<vmem>>
      %108 = tpu.memref_slice %arg7[%94, %c2_i32_90] : memref<2x8x!tpu.dma_semaphore, #tpu.memory_space<semaphore_mem>> -> memref<1x1x!tpu.dma_semaphore, #tpu.memory_space<semaphore_mem>>
      %109 = tpu.memref_squeeze %108 : memref<1x1x!tpu.dma_semaphore, #tpu.memory_space<semaphore_mem>> -> memref<!tpu.dma_semaphore, #tpu.memory_space<semaphore_mem>>
      tpu.wait_dma2 semaphore(%109 : memref<!tpu.dma_semaphore, #tpu.memory_space<semaphore_mem>>) src(%105 : memref<1x128xf32, #tpu.memory_space<any>>) dst(%107 : memref<1x128xf32, #tpu.memory_space<vmem>>)
      %c3_i32_95 = arith.constant 3 : i32
      %c0_i32_96 = arith.constant 0 : i32
      %c0_i32_97 = arith.constant 0 : i32
      %110 = tpu.memref_slice %arg2[%c0_i32_96, %c0_i32_97] : memref<1000x128xf32, #tpu.memory_space<any>> -> memref<1x128xf32, #tpu.memory_space<any>>
      %c3_i32_98 = arith.constant 3 : i32
      %c0_i32_99 = arith.constant 0 : i32
      %111 = tpu.memref_slice %arg6[%94, %c3_i32_98, %c0_i32_99] : memref<2x8x128xf32, #tpu.memory_space<vmem>> -> memref<1x1x128xf32, #tpu.memory_space<vmem>>
      %112 = tpu.memref_squeeze %111 : memref<1x1x128xf32, #tpu.memory_space<vmem>> -> memref<1x128xf32, #tpu.memory_space<vmem>>
      %113 = tpu.memref_slice %arg7[%94, %c3_i32_95] : memref<2x8x!tpu.dma_semaphore, #tpu.memory_space<semaphore_mem>> -> memref<1x1x!tpu.dma_semaphore, #tpu.memory_space<semaphore_mem>>
      %114 = tpu.memref_squeeze %113 : memref<1x1x!tpu.dma_semaphore, #tpu.memory_space<semaphore_mem>> -> memref<!tpu.dma_semaphore, #tpu.memory_space<semaphore_mem>>
      tpu.wait_dma2 semaphore(%114 : memref<!tpu.dma_semaphore, #tpu.memory_space<semaphore_mem>>) src(%110 : memref<1x128xf32, #tpu.memory_space<any>>) dst(%112 : memref<1x128xf32, #tpu.memory_space<vmem>>)
      %c4_i32_100 = arith.constant 4 : i32
      %c0_i32_101 = arith.constant 0 : i32
      %c0_i32_102 = arith.constant 0 : i32
      %115 = tpu.memref_slice %arg2[%c0_i32_101, %c0_i32_102] : memref<1000x128xf32, #tpu.memory_space<any>> -> memref<1x128xf32, #tpu.memory_space<any>>
      %c4_i32_103 = arith.constant 4 : i32
      %c0_i32_104 = arith.constant 0 : i32
      %116 = tpu.memref_slice %arg6[%94, %c4_i32_103, %c0_i32_104] : memref<2x8x128xf32, #tpu.memory_space<vmem>> -> memref<1x1x128xf32, #tpu.memory_space<vmem>>
      %117 = tpu.memref_squeeze %116 : memref<1x1x128xf32, #tpu.memory_space<vmem>> -> memref<1x128xf32, #tpu.memory_space<vmem>>
      %118 = tpu.memref_slice %arg7[%94, %c4_i32_100] : memref<2x8x!tpu.dma_semaphore, #tpu.memory_space<semaphore_mem>> -> memref<1x1x!tpu.dma_semaphore, #tpu.memory_space<semaphore_mem>>
      %119 = tpu.memref_squeeze %118 : memref<1x1x!tpu.dma_semaphore, #tpu.memory_space<semaphore_mem>> -> memref<!tpu.dma_semaphore, #tpu.memory_space<semaphore_mem>>
      tpu.wait_dma2 semaphore(%119 : memref<!tpu.dma_semaphore, #tpu.memory_space<semaphore_mem>>) src(%115 : memref<1x128xf32, #tpu.memory_space<any>>) dst(%117 : memref<1x128xf32, #tpu.memory_space<vmem>>)
      %c5_i32_105 = arith.constant 5 : i32
      %c0_i32_106 = arith.constant 0 : i32
      %c0_i32_107 = arith.constant 0 : i32
      %120 = tpu.memref_slice %arg2[%c0_i32_106, %c0_i32_107] : memref<1000x128xf32, #tpu.memory_space<any>> -> memref<1x128xf32, #tpu.memory_space<any>>
      %c5_i32_108 = arith.constant 5 : i32
      %c0_i32_109 = arith.constant 0 : i32
      %121 = tpu.memref_slice %arg6[%94, %c5_i32_108, %c0_i32_109] : memref<2x8x128xf32, #tpu.memory_space<vmem>> -> memref<1x1x128xf32, #tpu.memory_space<vmem>>
      %122 = tpu.memref_squeeze %121 : memref<1x1x128xf32, #tpu.memory_space<vmem>> -> memref<1x128xf32, #tpu.memory_space<vmem>>
      %123 = tpu.memref_slice %arg7[%94, %c5_i32_105] : memref<2x8x!tpu.dma_semaphore, #tpu.memory_space<semaphore_mem>> -> memref<1x1x!tpu.dma_semaphore, #tpu.memory_space<semaphore_mem>>
      %124 = tpu.memref_squeeze %123 : memref<1x1x!tpu.dma_semaphore, #tpu.memory_space<semaphore_mem>> -> memref<!tpu.dma_semaphore, #tpu.memory_space<semaphore_mem>>
      tpu.wait_dma2 semaphore(%124 : memref<!tpu.dma_semaphore, #tpu.memory_space<semaphore_mem>>) src(%120 : memref<1x128xf32, #tpu.memory_space<any>>) dst(%122 : memref<1x128xf32, #tpu.memory_space<vmem>>)
      %c6_i32_110 = arith.constant 6 : i32
      %c0_i32_111 = arith.constant 0 : i32
      %c0_i32_112 = arith.constant 0 : i32
      %125 = tpu.memref_slice %arg2[%c0_i32_111, %c0_i32_112] : memref<1000x128xf32, #tpu.memory_space<any>> -> memref<1x128xf32, #tpu.memory_space<any>>
      %c6_i32_113 = arith.constant 6 : i32
      %c0_i32_114 = arith.constant 0 : i32
      %126 = tpu.memref_slice %arg6[%94, %c6_i32_113, %c0_i32_114] : memref<2x8x128xf32, #tpu.memory_space<vmem>> -> memref<1x1x128xf32, #tpu.memory_space<vmem>>
      %127 = tpu.memref_squeeze %126 : memref<1x1x128xf32, #tpu.memory_space<vmem>> -> memref<1x128xf32, #tpu.memory_space<vmem>>
      %128 = tpu.memref_slice %arg7[%94, %c6_i32_110] : memref<2x8x!tpu.dma_semaphore, #tpu.memory_space<semaphore_mem>> -> memref<1x1x!tpu.dma_semaphore, #tpu.memory_space<semaphore_mem>>
      %129 = tpu.memref_squeeze %128 : memref<1x1x!tpu.dma_semaphore, #tpu.memory_space<semaphore_mem>> -> memref<!tpu.dma_semaphore, #tpu.memory_space<semaphore_mem>>
      tpu.wait_dma2 semaphore(%129 : memref<!tpu.dma_semaphore, #tpu.memory_space<semaphore_mem>>) src(%125 : memref<1x128xf32, #tpu.memory_space<any>>) dst(%127 : memref<1x128xf32, #tpu.memory_space<vmem>>)
      %c7_i32_115 = arith.constant 7 : i32
      %c0_i32_116 = arith.constant 0 : i32
      %c0_i32_117 = arith.constant 0 : i32
      %130 = tpu.memref_slice %arg2[%c0_i32_116, %c0_i32_117] : memref<1000x128xf32, #tpu.memory_space<any>> -> memref<1x128xf32, #tpu.memory_space<any>>
      %c7_i32_118 = arith.constant 7 : i32
      %c0_i32_119 = arith.constant 0 : i32
      %131 = tpu.memref_slice %arg6[%94, %c7_i32_118, %c0_i32_119] : memref<2x8x128xf32, #tpu.memory_space<vmem>> -> memref<1x1x128xf32, #tpu.memory_space<vmem>>
      %132 = tpu.memref_squeeze %131 : memref<1x1x128xf32, #tpu.memory_space<vmem>> -> memref<1x128xf32, #tpu.memory_space<vmem>>
      %133 = tpu.memref_slice %arg7[%94, %c7_i32_115] : memref<2x8x!tpu.dma_semaphore, #tpu.memory_space<semaphore_mem>> -> memref<1x1x!tpu.dma_semaphore, #tpu.memory_space<semaphore_mem>>
      %134 = tpu.memref_squeeze %133 : memref<1x1x!tpu.dma_semaphore, #tpu.memory_space<semaphore_mem>> -> memref<!tpu.dma_semaphore, #tpu.memory_space<semaphore_mem>>
      tpu.wait_dma2 semaphore(%134 : memref<!tpu.dma_semaphore, #tpu.memory_space<semaphore_mem>>) src(%130 : memref<1x128xf32, #tpu.memory_space<any>>) dst(%132 : memref<1x128xf32, #tpu.memory_space<vmem>>)
      %c1_i32_120 = arith.constant 1 : i32
      %135 = arith.addi %93, %c1_i32_120 : i32
      %c12_i32_121 = arith.constant 12 : i32
      %136 = arith.cmpi slt, %135, %c12_i32_121 : i32
      %137 = arith.extui %136 : i1 to i32
      %c0_i32_122 = arith.constant 0 : i32
      %138 = arith.cmpi ne, %137, %c0_i32_122 : i32
      scf.if %138 {
        %c1_i32_129 = arith.constant 1 : i32
        %145 = arith.addi %93, %c1_i32_129 : i32
        %c1_i32_130 = arith.constant 1 : i32
        %146 = arith.subi %c1_i32_130, %94 : i32
        %c16_i32 = arith.constant 16 : i32
        %147 = arith.muli %145, %c16_i32 : i32
        %c8_i32_131 = arith.constant 8 : i32
        %148 = arith.muli %arg0, %c8_i32_131 : i32
        %149 = arith.addi %147, %148 : i32
        %c0_i32_132 = arith.constant 0 : i32
        %150 = arith.addi %149, %c0_i32_132 : i32
        %151 = arith.index_cast %150 : i32 to index
        %152 = memref.load %arg1[%151] : memref<192xi32, #tpu.memory_space<smem>>
        %c0_i32_133 = arith.constant 0 : i32
        %c0_i32_134 = arith.constant 0 : i32
        %153 = tpu.memref_slice %arg2[%152, %c0_i32_134] : memref<1000x128xf32, #tpu.memory_space<any>> -> memref<1x128xf32, #tpu.memory_space<any>>
        %c0_i32_135 = arith.constant 0 : i32
        %c0_i32_136 = arith.constant 0 : i32
        %154 = tpu.memref_slice %arg6[%146, %c0_i32_135, %c0_i32_136] : memref<2x8x128xf32, #tpu.memory_space<vmem>> -> memref<1x1x128xf32, #tpu.memory_space<vmem>>
        %155 = tpu.memref_squeeze %154 : memref<1x1x128xf32, #tpu.memory_space<vmem>> -> memref<1x128xf32, #tpu.memory_space<vmem>>
        %156 = tpu.memref_slice %arg7[%146, %c0_i32_133] : memref<2x8x!tpu.dma_semaphore, #tpu.memory_space<semaphore_mem>> -> memref<1x1x!tpu.dma_semaphore, #tpu.memory_space<semaphore_mem>>
        %157 = tpu.memref_squeeze %156 : memref<1x1x!tpu.dma_semaphore, #tpu.memory_space<semaphore_mem>> -> memref<!tpu.dma_semaphore, #tpu.memory_space<semaphore_mem>>
        tpu.enqueue_dma source(%153 : memref<1x128xf32, #tpu.memory_space<any>>) target(%155 : memref<1x128xf32, #tpu.memory_space<vmem>>) target_semaphore(%157 : memref<!tpu.dma_semaphore, #tpu.memory_space<semaphore_mem>>)
        %c16_i32_137 = arith.constant 16 : i32
        %158 = arith.muli %145, %c16_i32_137 : i32
        %c8_i32_138 = arith.constant 8 : i32
        %159 = arith.muli %arg0, %c8_i32_138 : i32
        %160 = arith.addi %158, %159 : i32
        %c1_i32_139 = arith.constant 1 : i32
        %161 = arith.addi %160, %c1_i32_139 : i32
        %162 = arith.index_cast %161 : i32 to index
        %163 = memref.load %arg1[%162] : memref<192xi32, #tpu.memory_space<smem>>
        %c1_i32_140 = arith.constant 1 : i32
        %c0_i32_141 = arith.constant 0 : i32
        %164 = tpu.memref_slice %arg2[%163, %c0_i32_141] : memref<1000x128xf32, #tpu.memory_space<any>> -> memref<1x128xf32, #tpu.memory_space<any>>
        %c1_i32_142 = arith.constant 1 : i32
        %c0_i32_143 = arith.constant 0 : i32
        %165 = tpu.memref_slice %arg6[%146, %c1_i32_142, %c0_i32_143] : memref<2x8x128xf32, #tpu.memory_space<vmem>> -> memref<1x1x128xf32, #tpu.memory_space<vmem>>
        %166 = tpu.memref_squeeze %165 : memref<1x1x128xf32, #tpu.memory_space<vmem>> -> memref<1x128xf32, #tpu.memory_space<vmem>>
        %167 = tpu.memref_slice %arg7[%146, %c1_i32_140] : memref<2x8x!tpu.dma_semaphore, #tpu.memory_space<semaphore_mem>> -> memref<1x1x!tpu.dma_semaphore, #tpu.memory_space<semaphore_mem>>
        %168 = tpu.memref_squeeze %167 : memref<1x1x!tpu.dma_semaphore, #tpu.memory_space<semaphore_mem>> -> memref<!tpu.dma_semaphore, #tpu.memory_space<semaphore_mem>>
        tpu.enqueue_dma source(%164 : memref<1x128xf32, #tpu.memory_space<any>>) target(%166 : memref<1x128xf32, #tpu.memory_space<vmem>>) target_semaphore(%168 : memref<!tpu.dma_semaphore, #tpu.memory_space<semaphore_mem>>)
        %c16_i32_144 = arith.constant 16 : i32
        %169 = arith.muli %145, %c16_i32_144 : i32
        %c8_i32_145 = arith.constant 8 : i32
        %170 = arith.muli %arg0, %c8_i32_145 : i32
        %171 = arith.addi %169, %170 : i32
        %c2_i32_146 = arith.constant 2 : i32
        %172 = arith.addi %171, %c2_i32_146 : i32
        %173 = arith.index_cast %172 : i32 to index
        %174 = memref.load %arg1[%173] : memref<192xi32, #tpu.memory_space<smem>>
        %c2_i32_147 = arith.constant 2 : i32
        %c0_i32_148 = arith.constant 0 : i32
        %175 = tpu.memref_slice %arg2[%174, %c0_i32_148] : memref<1000x128xf32, #tpu.memory_space<any>> -> memref<1x128xf32, #tpu.memory_space<any>>
        %c2_i32_149 = arith.constant 2 : i32
        %c0_i32_150 = arith.constant 0 : i32
        %176 = tpu.memref_slice %arg6[%146, %c2_i32_149, %c0_i32_150] : memref<2x8x128xf32, #tpu.memory_space<vmem>> -> memref<1x1x128xf32, #tpu.memory_space<vmem>>
        %177 = tpu.memref_squeeze %176 : memref<1x1x128xf32, #tpu.memory_space<vmem>> -> memref<1x128xf32, #tpu.memory_space<vmem>>
        %178 = tpu.memref_slice %arg7[%146, %c2_i32_147] : memref<2x8x!tpu.dma_semaphore, #tpu.memory_space<semaphore_mem>> -> memref<1x1x!tpu.dma_semaphore, #tpu.memory_space<semaphore_mem>>
        %179 = tpu.memref_squeeze %178 : memref<1x1x!tpu.dma_semaphore, #tpu.memory_space<semaphore_mem>> -> memref<!tpu.dma_semaphore, #tpu.memory_space<semaphore_mem>>
        tpu.enqueue_dma source(%175 : memref<1x128xf32, #tpu.memory_space<any>>) target(%177 : memref<1x128xf32, #tpu.memory_space<vmem>>) target_semaphore(%179 : memref<!tpu.dma_semaphore, #tpu.memory_space<semaphore_mem>>)
        %c16_i32_151 = arith.constant 16 : i32
        %180 = arith.muli %145, %c16_i32_151 : i32
        %c8_i32_152 = arith.constant 8 : i32
        %181 = arith.muli %arg0, %c8_i32_152 : i32
        %182 = arith.addi %180, %181 : i32
        %c3_i32_153 = arith.constant 3 : i32
        %183 = arith.addi %182, %c3_i32_153 : i32
        %184 = arith.index_cast %183 : i32 to index
        %185 = memref.load %arg1[%184] : memref<192xi32, #tpu.memory_space<smem>>
        %c3_i32_154 = arith.constant 3 : i32
        %c0_i32_155 = arith.constant 0 : i32
        %186 = tpu.memref_slice %arg2[%185, %c0_i32_155] : memref<1000x128xf32, #tpu.memory_space<any>> -> memref<1x128xf32, #tpu.memory_space<any>>
        %c3_i32_156 = arith.constant 3 : i32
        %c0_i32_157 = arith.constant 0 : i32
        %187 = tpu.memref_slice %arg6[%146, %c3_i32_156, %c0_i32_157] : memref<2x8x128xf32, #tpu.memory_space<vmem>> -> memref<1x1x128xf32, #tpu.memory_space<vmem>>
        %188 = tpu.memref_squeeze %187 : memref<1x1x128xf32, #tpu.memory_space<vmem>> -> memref<1x128xf32, #tpu.memory_space<vmem>>
        %189 = tpu.memref_slice %arg7[%146, %c3_i32_154] : memref<2x8x!tpu.dma_semaphore, #tpu.memory_space<semaphore_mem>> -> memref<1x1x!tpu.dma_semaphore, #tpu.memory_space<semaphore_mem>>
        %190 = tpu.memref_squeeze %189 : memref<1x1x!tpu.dma_semaphore, #tpu.memory_space<semaphore_mem>> -> memref<!tpu.dma_semaphore, #tpu.memory_space<semaphore_mem>>
        tpu.enqueue_dma source(%186 : memref<1x128xf32, #tpu.memory_space<any>>) target(%188 : memref<1x128xf32, #tpu.memory_space<vmem>>) target_semaphore(%190 : memref<!tpu.dma_semaphore, #tpu.memory_space<semaphore_mem>>)
        %c16_i32_158 = arith.constant 16 : i32
        %191 = arith.muli %145, %c16_i32_158 : i32
        %c8_i32_159 = arith.constant 8 : i32
        %192 = arith.muli %arg0, %c8_i32_159 : i32
        %193 = arith.addi %191, %192 : i32
        %c4_i32_160 = arith.constant 4 : i32
        %194 = arith.addi %193, %c4_i32_160 : i32
        %195 = arith.index_cast %194 : i32 to index
        %196 = memref.load %arg1[%195] : memref<192xi32, #tpu.memory_space<smem>>
        %c4_i32_161 = arith.constant 4 : i32
        %c0_i32_162 = arith.constant 0 : i32
        %197 = tpu.memref_slice %arg2[%196, %c0_i32_162] : memref<1000x128xf32, #tpu.memory_space<any>> -> memref<1x128xf32, #tpu.memory_space<any>>
        %c4_i32_163 = arith.constant 4 : i32
        %c0_i32_164 = arith.constant 0 : i32
        %198 = tpu.memref_slice %arg6[%146, %c4_i32_163, %c0_i32_164] : memref<2x8x128xf32, #tpu.memory_space<vmem>> -> memref<1x1x128xf32, #tpu.memory_space<vmem>>
        %199 = tpu.memref_squeeze %198 : memref<1x1x128xf32, #tpu.memory_space<vmem>> -> memref<1x128xf32, #tpu.memory_space<vmem>>
        %200 = tpu.memref_slice %arg7[%146, %c4_i32_161] : memref<2x8x!tpu.dma_semaphore, #tpu.memory_space<semaphore_mem>> -> memref<1x1x!tpu.dma_semaphore, #tpu.memory_space<semaphore_mem>>
        %201 = tpu.memref_squeeze %200 : memref<1x1x!tpu.dma_semaphore, #tpu.memory_space<semaphore_mem>> -> memref<!tpu.dma_semaphore, #tpu.memory_space<semaphore_mem>>
        tpu.enqueue_dma source(%197 : memref<1x128xf32, #tpu.memory_space<any>>) target(%199 : memref<1x128xf32, #tpu.memory_space<vmem>>) target_semaphore(%201 : memref<!tpu.dma_semaphore, #tpu.memory_space<semaphore_mem>>)
        %c16_i32_165 = arith.constant 16 : i32
        %202 = arith.muli %145, %c16_i32_165 : i32
        %c8_i32_166 = arith.constant 8 : i32
        %203 = arith.muli %arg0, %c8_i32_166 : i32
        %204 = arith.addi %202, %203 : i32
        %c5_i32_167 = arith.constant 5 : i32
        %205 = arith.addi %204, %c5_i32_167 : i32
        %206 = arith.index_cast %205 : i32 to index
        %207 = memref.load %arg1[%206] : memref<192xi32, #tpu.memory_space<smem>>
        %c5_i32_168 = arith.constant 5 : i32
        %c0_i32_169 = arith.constant 0 : i32
        %208 = tpu.memref_slice %arg2[%207, %c0_i32_169] : memref<1000x128xf32, #tpu.memory_space<any>> -> memref<1x128xf32, #tpu.memory_space<any>>
        %c5_i32_170 = arith.constant 5 : i32
        %c0_i32_171 = arith.constant 0 : i32
        %209 = tpu.memref_slice %arg6[%146, %c5_i32_170, %c0_i32_171] : memref<2x8x128xf32, #tpu.memory_space<vmem>> -> memref<1x1x128xf32, #tpu.memory_space<vmem>>
        %210 = tpu.memref_squeeze %209 : memref<1x1x128xf32, #tpu.memory_space<vmem>> -> memref<1x128xf32, #tpu.memory_space<vmem>>
        %211 = tpu.memref_slice %arg7[%146, %c5_i32_168] : memref<2x8x!tpu.dma_semaphore, #tpu.memory_space<semaphore_mem>> -> memref<1x1x!tpu.dma_semaphore, #tpu.memory_space<semaphore_mem>>
        %212 = tpu.memref_squeeze %211 : memref<1x1x!tpu.dma_semaphore, #tpu.memory_space<semaphore_mem>> -> memref<!tpu.dma_semaphore, #tpu.memory_space<semaphore_mem>>
        tpu.enqueue_dma source(%208 : memref<1x128xf32, #tpu.memory_space<any>>) target(%210 : memref<1x128xf32, #tpu.memory_space<vmem>>) target_semaphore(%212 : memref<!tpu.dma_semaphore, #tpu.memory_space<semaphore_mem>>)
        %c16_i32_172 = arith.constant 16 : i32
        %213 = arith.muli %145, %c16_i32_172 : i32
        %c8_i32_173 = arith.constant 8 : i32
        %214 = arith.muli %arg0, %c8_i32_173 : i32
        %215 = arith.addi %213, %214 : i32
        %c6_i32_174 = arith.constant 6 : i32
        %216 = arith.addi %215, %c6_i32_174 : i32
        %217 = arith.index_cast %216 : i32 to index
        %218 = memref.load %arg1[%217] : memref<192xi32, #tpu.memory_space<smem>>
        %c6_i32_175 = arith.constant 6 : i32
        %c0_i32_176 = arith.constant 0 : i32
        %219 = tpu.memref_slice %arg2[%218, %c0_i32_176] : memref<1000x128xf32, #tpu.memory_space<any>> -> memref<1x128xf32, #tpu.memory_space<any>>
        %c6_i32_177 = arith.constant 6 : i32
        %c0_i32_178 = arith.constant 0 : i32
        %220 = tpu.memref_slice %arg6[%146, %c6_i32_177, %c0_i32_178] : memref<2x8x128xf32, #tpu.memory_space<vmem>> -> memref<1x1x128xf32, #tpu.memory_space<vmem>>
        %221 = tpu.memref_squeeze %220 : memref<1x1x128xf32, #tpu.memory_space<vmem>> -> memref<1x128xf32, #tpu.memory_space<vmem>>
        %222 = tpu.memref_slice %arg7[%146, %c6_i32_175] : memref<2x8x!tpu.dma_semaphore, #tpu.memory_space<semaphore_mem>> -> memref<1x1x!tpu.dma_semaphore, #tpu.memory_space<semaphore_mem>>
        %223 = tpu.memref_squeeze %222 : memref<1x1x!tpu.dma_semaphore, #tpu.memory_space<semaphore_mem>> -> memref<!tpu.dma_semaphore, #tpu.memory_space<semaphore_mem>>
        tpu.enqueue_dma source(%219 : memref<1x128xf32, #tpu.memory_space<any>>) target(%221 : memref<1x128xf32, #tpu.memory_space<vmem>>) target_semaphore(%223 : memref<!tpu.dma_semaphore, #tpu.memory_space<semaphore_mem>>)
        %c16_i32_179 = arith.constant 16 : i32
        %224 = arith.muli %145, %c16_i32_179 : i32
        %c8_i32_180 = arith.constant 8 : i32
        %225 = arith.muli %arg0, %c8_i32_180 : i32
        %226 = arith.addi %224, %225 : i32
        %c7_i32_181 = arith.constant 7 : i32
        %227 = arith.addi %226, %c7_i32_181 : i32
        %228 = arith.index_cast %227 : i32 to index
        %229 = memref.load %arg1[%228] : memref<192xi32, #tpu.memory_space<smem>>
        %c7_i32_182 = arith.constant 7 : i32
        %c0_i32_183 = arith.constant 0 : i32
        %230 = tpu.memref_slice %arg2[%229, %c0_i32_183] : memref<1000x128xf32, #tpu.memory_space<any>> -> memref<1x128xf32, #tpu.memory_space<any>>
        %c7_i32_184 = arith.constant 7 : i32
        %c0_i32_185 = arith.constant 0 : i32
        %231 = tpu.memref_slice %arg6[%146, %c7_i32_184, %c0_i32_185] : memref<2x8x128xf32, #tpu.memory_space<vmem>> -> memref<1x1x128xf32, #tpu.memory_space<vmem>>
        %232 = tpu.memref_squeeze %231 : memref<1x1x128xf32, #tpu.memory_space<vmem>> -> memref<1x128xf32, #tpu.memory_space<vmem>>
        %233 = tpu.memref_slice %arg7[%146, %c7_i32_182] : memref<2x8x!tpu.dma_semaphore, #tpu.memory_space<semaphore_mem>> -> memref<1x1x!tpu.dma_semaphore, #tpu.memory_space<semaphore_mem>>
        %234 = tpu.memref_squeeze %233 : memref<1x1x!tpu.dma_semaphore, #tpu.memory_space<semaphore_mem>> -> memref<!tpu.dma_semaphore, #tpu.memory_space<semaphore_mem>>
        tpu.enqueue_dma source(%230 : memref<1x128xf32, #tpu.memory_space<any>>) target(%232 : memref<1x128xf32, #tpu.memory_space<vmem>>) target_semaphore(%234 : memref<!tpu.dma_semaphore, #tpu.memory_space<semaphore_mem>>)
      } else {
      }
      %c0_123 = arith.constant 0 : index
      %c0_124 = arith.constant 0 : index
      %139 = vector.load %arg8[%c0_123, %c0_124] : memref<8x128xf32, #tpu.memory_space<vmem>>, vector<8x128xf32>
      %140 = arith.index_cast %94 : i32 to index
      %c0_125 = arith.constant 0 : index
      %c0_126 = arith.constant 0 : index
      %141 = vector.load %arg6[%140, %c0_125, %c0_126] : memref<2x8x128xf32, #tpu.memory_space<vmem>>, vector<1x8x128xf32>
      %142 = vector.shape_cast %141 : vector<1x8x128xf32> to vector<8x128xf32>
      %143 = arith.addf %139, %142 : vector<8x128xf32>
      %c0_127 = arith.constant 0 : index
      %c0_128 = arith.constant 0 : index
      %144 = vector.load %arg8[%c0_127, %c0_128] : memref<8x128xf32, #tpu.memory_space<vmem>>, vector<8x128xf32>
      tpu.vector_store %arg8[%c0_127, %c0_128], %143 {strides = array<i32>} : memref<8x128xf32, #tpu.memory_space<vmem>>, vector<8x128xf32>,
    }
    %c12_i32_66 = arith.constant 12 : i32
    %c0_67 = arith.constant 0 : index
    %c0_68 = arith.constant 0 : index
    %83 = vector.load %arg8[%c0_67, %c0_68] : memref<8x128xf32, #tpu.memory_space<vmem>>, vector<8x128xf32>
    %cst_69 = arith.constant 0.0833333358 : f32
    %84 = vector.broadcast %cst_69 : f32 to vector<8x128xf32>
    %85 = arith.mulf %83, %84 : vector<8x128xf32>
    %c0_70 = arith.constant 0 : index
    %c0_71 = arith.constant 0 : index
    %86 = vector.load %arg3[%c0_70, %c0_71] : memref<128x128xf32, #tpu.memory_space<vmem>>, vector<128x128xf32>
    %cst_72 = arith.constant dense<0.000000e+00> : vector<8x128xf32>
    %87 = tpu.matmul %85, %86, %cst_72 {dimension_numbers = #tpu.dot_dimension_numbers<[1], [0], [0], [1], [0, 0, 1, 1], [], []>} : vector<8x128xf32>, vector<128x128xf32>, vector<8x128xf32> -> vector<8x128xf32>
    %c0_73 = arith.constant 0 : index
    %c0_74 = arith.constant 0 : index
    %88 = vector.load %arg4[%c0_73, %c0_74] : memref<1x128xf32, #tpu.memory_space<vmem>>, vector<1x128xf32>
    %89 = vector.broadcast %88 : vector<1x128xf32> to vector<8x128xf32>
    %90 = arith.addf %87, %89 : vector<8x128xf32>
    %c0_75 = arith.constant 0 : index
    %c0_76 = arith.constant 0 : index
    %91 = vector.load %arg5[%c0_75, %c0_76] : memref<8x128xf32, #tpu.memory_space<vmem>>, vector<8x128xf32>
    tpu.vector_store %arg5[%c0_75, %c0_76], %90 {strides = array<i32>} : memref<8x128xf32, #tpu.memory_space<vmem>>, vector<8x128xf32>,
    return
  }
  func.func @transform_1(%arg0: i32, %arg1: memref<192xi32, #tpu.memory_space<smem>>) -> (i32, i32) {
    %c0_i32 = arith.constant 0 : i32
    %c0_i32_0 = arith.constant 0 : i32
    %c0_i32_1 = arith.constant 0 : i32
    return %c0_i32, %c0_i32_0 : i32, i32
  }
  func.func @transform_2(%arg0: i32, %arg1: memref<192xi32, #tpu.memory_space<smem>>) -> (i32, i32) {
    %c0_i32 = arith.constant 0 : i32
    %c0_i32_0 = arith.constant 0 : i32
    %c0_i32_1 = arith.constant 0 : i32
    return %c0_i32, %c0_i32_0 : i32, i32
  }
  func.func @transform_3(%arg0: i32, %arg1: memref<192xi32, #tpu.memory_space<smem>>) -> (i32, i32) {
    %c0_i32 = arith.constant 0 : i32
    %c0_i32_0 = arith.constant 0 : i32
    return %arg0, %c0_i32 : i32, i32
  }
}

</mosaic_0001>

<bundles_post_ra>
// kernel: tpu_custom_call.1
= control target key start
LH: loop header
LB: loop body
LE: loop exit
PB: predicated region body
PF: predicated region fallthrough
CT: control target
= control target key end

     0   :  { %s2370_s0 = inlined_call_operand.hbm [shape: s32[192], index: 0, kind: input, shape index: {}]   ;;  %s2371_s1 = inlined_call_operand.hbm [shape: f32[1000,128], index: 1, kind: input, shape index: {}]   ;;  %s2372_s2 = inlined_call_operand.hbm [shape: f32[128,128], index: 2, kind: input, shape index: {}]   ;;  %s2373_s3 = inlined_call_operand.hbm [shape: f32[1,128], index: 3, kind: input, shape index: {}]   ;;  %s2374_s4 = inlined_call_operand.hbm [shape: f32[16,128], index: 4, kind: output, shape index: {}]  }
   0x1   :  { %2386 = sst [smem:[#allocation74_spill]] %s2372_s2  ;;  %s1142_s17 = scalar_lea.hbm %s2370_s0, 32 }
   0x2   :  { %2387 = sst [smem:[#allocation75_spill]] %s2373_s3  ;;  %p1143_p0 = scmp.ne.s32.totalorder %s2370_s0, %s1142_s17 }
   0x3   :  { %p1146_p1 = scmp.lt.u32.totalorder %s1142_s17, %s2370_s0 }
   0x5   :  { %p1148_p2 = pnand %p1146_p1, %p1143_p0 }
   0x7   :  { %1151 = shalt.err (!%p1148_p2)  }
   0x8   :  { %s1722_s22 = smov [#allocation6]  }
   0x9   :  { %10 = dma.hbm_to_smem %s2370_s0, 32, %s1722_s22, [#allocation5] }
   0xa   :  { %1672 = dma.done.wait [#allocation5], 32 }
   0xb   :  { %1673 = vsyncadd [#allocation5], 4294967264 }
   0xc   :  { %12 = sfence }
   0xd   :  { %13 = vsyncpa [#allocation8], 0 }
   0xe   :  { %14 = vsyncpa [#allocation11], 0 }
   0xf   :  { %15 = vsyncpa [#allocation9], 0 }
  0x10   :  { %17 = vsyncpa [#allocation9 + $0x1], 0  ;;  %s1776_s25 = smov 0   ;;  %s1778_s26 = smov 0  }
  0x11   :  { %s1780_s27 = smov 0   ;;  %s1782_s28 = smov 0  }
  0x12 LB: > { %2388 = sst [smem:[#allocation67_spill]] %s1704_s25  ;;  %s1797_s0 = sadd.s32 4294967295, %s1716_s28   ;;  %s1716_s28 = sphi %s1782_s28, %s2420_s28   ;;  %s1712_s27 = sphi %s1780_s27, %s2422_s27   ;;  %s1708_s26 = sphi %s1778_s26, %s2424_s26   ;;  %s1704_s25 = sphi %s1776_s25, %s2423_s25  }
  0x13   : > { %2389 = sst [smem:[#allocation68_spill]] %s1712_s27  ;;  %s885_s29 = sadd.s32 4294967294, %s1716_s28  }
  0x14   : > { %2390 = sst [smem:[#allocation69_spill]] %s1716_s28  ;;  %s1801_s30 = sadd.s32 1, %s1716_s28  }
  0x15   : > { %2391 = sst [smem:[#allocation70_spill]] %s1801_s30  ;;  %s72_s5 = sadd.s32 1, %s1712_s27 }
  0x16   : > { %s69_s6 = ssub.s32 %s1716_s28, %s1801_s30  ;;  %p82_p3 = scmp.ne.s32.totalorder %s1712_s27, %s1708_s26 }
  0x17   : > { %p70_p4 = scmp.eq.s32.totalorder %s69_s6, 0  ;;  %p83_p5 = scmp.eq.s32.totalorder %s1797_s0, 1 }
  0x18   : > { %p88_p6 = scmp.ne.s32.totalorder %s1708_s26, %s1704_s25  ;;  %p89_p7 = scmp.eq.s32.totalorder %s885_s29, 1 }
  0x19   : > { %s1812_s7 = scalar_select %p70_p4, %s1712_s27, %s72_s5  }
  0x1a   : > { %p1814_p8 = por %p83_p5, %p82_p3  ;;  %p1818_p9 = por %p89_p7, %p88_p6 }
  0x1b   : > { %2392 = sst [smem:[#allocation71_spill]] %s1812_s7  ;;  %p886_p10 = scmp.ge.s32.totalorder %s1716_s28, 1 }
  0x1c   : > { %s2393_s8 = scalar_select %p1814_p8, 1, 0 }
  0x1d   : > { %s2394_s9 = scalar_select %p1818_p9, 1, 0 }
  0x1e   : > { %p96_p11 = scmp.lt.s32.totalorder %s1716_s28, 3  ;;  %p2375_p12 = scmp.eq.s32.totalorder %s1797_s0, 0 }
  0x1f   : > { %2395 = sst [smem:[#allocation72_spill]] %s2394_s9  ;;  %s1723_s11 = smov [#allocation7]  }
  0x20   : > { %p1825_p13 = pnand %p886_p10, %p96_p11  ;;  %s108_s12 = sshll.u32 %s1723_s11, 4  ;;  %s109_s12 = int_to_ptr.vmem [resolvable:$true] %s108_s12 }
  0x21   : > { %s1724_s14 = smov [#allocation10]   ;;  %s2398_s2 = sld [smem:[#allocation74_spill]] }
  0x22   : > { %s2396_s10 = scalar_select %p1825_p13, 1, 0 }
  0x23   : > { %p1069_p0 = pneg %p1825_p13  ;;  %s122_s15 = sshll.u32 %s1724_s14, 4  ;;  %s1837_s15 = int_to_ptr.vmem [resolvable:$true] %s122_s15 }
  0x25   : > { %p1833_p1 = pnand %p2375_p12, %p1069_p0 }
  0x27   : > { %s1152_s18 = scalar_lea.hbm %s2398_s2, 2048  ;;  %p1154_p3 = pneg %p1833_p1 }
  0x28   : > { %p1153_p2 = scmp.ne.s32.totalorder %s2398_s2, %s1152_s18  ;;  %p1159_p6 = scmp.lt.u32.totalorder %s1152_s18, %s2398_s2 }
  0x2a   : > { %p1155_p4 = pnand %p1154_p3, %p1153_p2 }
  0x2c   : > { %p1156_p5 = pneg %p1155_p4 }
  0x2e   : > { %p1161_p7 = pnand %p1159_p6, %p1156_p5 }
  0x30   : > { %1164 = shalt.err (!%p1161_p7)
}
  0x31   : > { %s1165_s23 = scalar_lea.vmem %s109_s12, 2048  ;;  %p1173_p12 = scmp.lt.s32.totalorder %s109_s12, %s109_s12 }
  0x32   : > { %p1166_p10 = scmp.ne.s32.totalorder %s109_s12, %s1165_s23  ;;  %p1174_p9 = scmp.lt.s32.totalorder %s1165_s23, %s1165_s23 }
  0x34   : > { %p1168_p11 = pnand %p1166_p10, %p1154_p3  ;;  %p1175_p8 = por %p1174_p9, %p1173_p12 }
  0x36   : > { %p1169_p0 = pneg %p1168_p11 }
  0x38   : > { %p1176_p13 = pnand %p1175_p8, %p1169_p0 }
  0x3a   : > { %1179 = shalt.err (!%p1176_p13)
}
  0x3b   : > { %s1725_s24 = smov 128   ;;  %s1726_s29 = smov 8  }
  0x3c   : > { %1072 = dma.hbm_to_vmem [thread:$0]  (!%p1833_p1), %s2398_s2, 2048, %s109_s12, [#allocation8], %s1725_s24, %s1725_s24, %s1726_s29  }
  0x3d   : > { %s2399_s3 = sld [smem:[#allocation75_spill]] }
  0x43   : > { %s1180_s16 = scalar_lea.hbm %s2399_s3, 16 }
  0x44   : > { %p1181_p2 = scmp.ne.s32.totalorder %s2399_s3, %s1180_s16  ;;  %p1187_p12 = scmp.lt.u32.totalorder %s1180_s16, %s2399_s3 }
  0x46   : > { %p1183_p8 = pnand %p1181_p2, %p1154_p3 }
  0x48   : > { %p1184_p9 = pneg %p1183_p8 }
  0x4a   : > { %p1189_p13 = pnand %p1187_p12, %p1184_p9 }
  0x4c   : > { %1192 = shalt.err (!%p1189_p13)
}
  0x4d   : > { %s1193_s12 = scalar_lea.vmem %s1837_s15, 16  ;;  %s1200_s21 = scalar_lea.vmem %s1837_s15, 32 }
  0x4e   : > { %p1194_p4 = scmp.ne.s32.totalorder %s1837_s15, %s1193_s12  ;;  %p1201_p7 = scmp.lt.s32.totalorder %s1837_s15, %s1837_s15 }
  0x4f   : > { %p1202_p10 = scmp.lt.s32.totalorder %s1200_s21, %s1193_s12 }
  0x50   : > { %p1196_p5 = pnand %p1194_p4, %p1154_p3 }
  0x51   : > { %p1203_p11 = por %p1202_p10, %p1201_p7 }
  0x52   : > { %p1197_p6 = pneg %p1196_p5 }
  0x54   : > { %p1204_p0 = pnand %p1203_p11, %p1197_p6 }
  0x56   : > { %1207 = shalt.err (!%p1204_p0)
}
  0x57   : > { %1075 = dma.hbm_to_vmem [thread:$0]  (!%p1833_p1), %s2399_s3, 16, %s1837_s15, [#allocation11]  }
  0x58   : > { %p2400_p2 = scmp.ne.s32.totalorder %s2396_s10, 0 }
  0x5a   : > { %135 = sbr.rel (%p2400_p2) target bundleno = 793 (0x319), region = 28 }
  0x61   : > { %p2401_p3 = scmp.eq.s32.totalorder %s1797_s0, 0 }
  0x63   : > { %1675 = dma.done.wait (%p2401_p3), [#allocation8], 2048   ;;  %p2402_p8 = pmov %p2401_p3 }
  0x64   : > { %p2403_p9 = pmov %p2401_p3 }
  0x65   : > { %1677 = vsyncadd (%p2402_p8), [#allocation8], 4294965248 }
  0x66   : > { %1679 = dma.done.wait (%p2403_p9), [#allocation11], 16   ;;  %p2404_p12 = pmov %p2401_p3 }
  0x67   : > { %s1898_s13 = sshll.u32 %s1797_s0, 3  ;;  %s1727_s15 = smov [#allocation2]   ;;  %v1728_v0 = vmov 0.0  }
  0x68   : > { %1681 = vsyncadd (%p2404_p12), [#allocation11], 4294967280  ;;  %2405 = sst [smem:[#allocation73_spill]] %s1898_s13  ;;  %s168_s24 = sshll.u32 %s1727_s15, 4  ;;  %156 = vst [vmem:[#allocation4] sm:$0xff] %v1728_v0  ;;  %s1902_s24 = int_to_ptr.vmem [resolvable:$true] %s168_s24 }
  0x69   : > { %s158_s10 = sld [smem:[#allocation6 + %s1898_s13]]  ;;  %s172_s29 = sadd.s32 1, %s1898_s13 }
  0x6a   : > { %s1905_s5 = sld [smem:[#allocation6 + %s172_s29]]  ;;  %s1729_s6 = smov [#allocation2 + $0x1]  }
  0x6b   : > { %s185_s11 = sshll.u32 %s1729_s6, 4  ;;  %s189_s14 = sadd.s32 2, %s1898_s13  ;;  %s1908_s11 = int_to_ptr.vmem [resolvable:$true] %s185_s11 }
  0x6c   : > { %s1910_s16 = sld [smem:[#allocation6 + %s189_s14]]  ;;  %s206_s17 = sadd.s32 3, %s1898_s13 }
  0x6d   : > { %s1730_s19 = smov [#allocation2 + $0x2]   ;;  %s1921_s6 = scalar_lea.hbm %s2371_s1, 16000 }
  0x6e   : > { %s202_s20 = sshll.u32 %s1730_s19, 4  ;;  %s1916_s20 = int_to_ptr.vmem [resolvable:$true] %s202_s20 }
  0x6f   : > { %s894_s18 = sshll.u32 %s158_s10, 4 }
  0x70   : > { %s160_s22 = scalar_lea.hbm %s2371_s1, %s894_s18 }
  0x71   : > { %s1208_s23 = scalar_lea.hbm %s160_s22, 16  ;;  %p1211_p13 = scmp.lt.u32.totalorder %s160_s22, %s2371_s1 }
  0x72   : > { %p1209_p1 = scmp.ne.s32.totalorder %s160_s22, %s1208_s23  ;;  %p1212_p4 = scmp.lt.u32.totalorder %s1921_s6, %s1208_s23 }
  0x73   : > { %p1214_p6 = scmp.lt.u32.totalorder %s1208_s23, %s160_s22 }
  0x74   : > { %p1213_p5 = por %p1212_p4, %p1211_p13 }
  0x76   : > { %p1215_p7 = por %p1214_p6, %p1213_p5 }
  0x78   : > { %p1216_p10 = pnand %p1215_p7, %p1209_p1 }
  0x7a   : > { %1219 = shalt.err (!%p1216_p10)  }
  0x7b   : > { %s1220_s10 = scalar_lea.vmem %s1902_s24, 16  ;;  %s1930_s18 = scalar_lea.vmem %s1902_s24, 256 }
  0x7c   : > { %p1221_p11 = scmp.ne.s32.totalorder %s1902_s24, %s1220_s10  ;;  %p1225_p0 = scmp.lt.s32.totalorder %s1902_s24, %s1902_s24 }
  0x7d   : > { %p1226_p2 = scmp.lt.s32.totalorder %s1930_s18, %s1220_s10 }
  0x7f   : > { %p1227_p3 = por %p1226_p2, %p1225_p0 }
  0x81   : > { %p1228_p8 = pnand %p1227_p3, %p1221_p11 }
  0x83   : > { %1231 = shalt.err (!%p1228_p8)  }
  0x84   : > { %171 = dma.hbm_to_vmem [thread:$0]  %s160_s22, 16, %s1902_s24, [#allocation3] }
  0x85   : > { %s895_s2 = sshll.u32 %s1905_s5, 4  ;;  %s1937_s19 = sld [smem:[#allocation6 + %s206_s17]] }
  0x86   : > { %s175_s23 = scalar_lea.hbm %s2371_s1, %s895_s2  ;;  %s896_s15 = sshll.u32 %s1910_s16, 4 }
  0x87   : > { %s1232_s29 = scalar_lea.hbm %s175_s23, 16  ;;  %p1235_p12 = scmp.lt.u32.totalorder %s175_s23, %s2371_s1 }
  0x88   : > { %p1233_p9 = scmp.ne.s32.totalorder %s175_s23, %s1232_s29  ;;  %p1236_p1 = scmp.lt.u32.totalorder %s1921_s6, %s1232_s29 }
  0x89   : > { %p1238_p4 = scmp.lt.u32.totalorder %s1232_s29, %s175_s23 }
  0x8a   : > { %p1237_p13 = por %p1236_p1, %p1235_p12 }
  0x8c   : > { %p1239_p5 = por %p1238_p4, %p1237_p13 }
  0x8e   : > { %p1240_p6 = pnand %p1239_p5, %p1233_p9 }
  0x90   : > { %1243 = shalt.err (!%p1240_p6)  }
  0x91   : > { %s1244_s5 = scalar_lea.vmem %s1908_s11, 16  ;;  %p1249_p10 = scmp.lt.s32.totalorder %s1908_s11, %s1902_s24 }
  0x92   : > { %p1245_p7 = scmp.ne.s32.totalorder %s1908_s11, %s1244_s5  ;;  %p1250_p11 = scmp.lt.s32.totalorder %s1930_s18, %s1244_s5 }
  0x94   : > { %p1251_p0 = por %p1250_p11, %p1249_p10 }
  0x96   : > { %p1252_p2 = pnand %p1251_p0, %p1245_p7 }
  0x98   : > { %1255 = shalt.err (!%p1252_p2)  }
  0x99   : > { %188 = dma.hbm_to_vmem [thread:$0]  %s175_s23, 16, %s1908_s11, [#allocation3 + $0x1] }
  0x9a   : > { %s192_s22 = scalar_lea.hbm %s2371_s1, %s896_s15 }
  0x9b   : > { %s1256_s2 = scalar_lea.hbm %s192_s22, 16  ;;  %p1259_p8 = scmp.lt.u32.totalorder %s192_s22, %s2371_s1 }
  0x9c   : > { %p1257_p3 = scmp.ne.s32.totalorder %s192_s22, %s1256_s2  ;;  %p1260_p9 = scmp.lt.u32.totalorder %s1921_s6, %s1256_s2 }
  0x9d   : > { %p1262_p1 = scmp.lt.u32.totalorder %s1256_s2, %s192_s22 }
  0x9e   : > { %p1261_p12 = por %p1260_p9, %p1259_p8 }
  0xa0   : > { %p1263_p13 = por %p1262_p1, %p1261_p12 }
  0xa2   : > { %p1264_p4 = pnand %p1263_p13, %p1257_p3 }
  0xa4   : > { %1267 = shalt.err (!%p1264_p4)  }
  0xa5   : > { %s1268_s11 = scalar_lea.vmem %s1916_s20, 16  ;;  %p1273_p6 = scmp.lt.s32.totalorder %s1916_s20, %s1902_s24 }
  0xa6   : > { %p1269_p5 = scmp.ne.s32.totalorder %s1916_s20, %s1268_s11  ;;  %p1274_p7 = scmp.lt.s32.totalorder %s1930_s18, %s1268_s11 }
  0xa8   : > { %p1275_p10 = por %p1274_p7, %p1273_p6 }
  0xaa   : > { %p1276_p11 = pnand %p1275_p10, %p1269_p5 }
  0xac   : > { %1279 = shalt.err (!%p1276_p11)  }
  0xad   : > { %205 = dma.hbm_to_vmem [thread:$0]  %s192_s22, 16, %s1916_s20, [#allocation3 + $0x2] }
  0xae   : > { %s1731_s23 = smov [#allocation2 + $0x3]   ;;  %s223_s29 = sadd.s32 4, %s1898_s13 }
  0xaf   : > { %s219_s15 = sshll.u32 %s1731_s23, 4  ;;  %s897_s14 = sshll.u32 %s1937_s19, 4  ;;  %s220_s15 = int_to_ptr.vmem [resolvable:$true] %s219_s15 }
  0xb0   : > { %s209_s16 = scalar_lea.hbm %s2371_s1, %s897_s14  ;;  %s1971_s17 = sld [smem:[#allocation6 + %s223_s29]] }
  0xb1   : > { %s1280_s2 = scalar_lea.hbm %s209_s16, 16  ;;  %p1283_p2 = scmp.lt.u32.totalorder %s209_s16, %s2371_s1 }
  0xb2   : > { %p1281_p0 = scmp.ne.s32.totalorder %s209_s16, %s1280_s2  ;;  %p1284_p3 = scmp.lt.u32.totalorder %s1921_s6, %s1280_s2 }
  0xb3   : > { %p1286_p9 = scmp.lt.u32.totalorder %s1280_s2, %s209_s16 }
  0xb4   : > { %p1285_p8 = por %p1284_p3, %p1283_p2 }
  0xb6   : > { %p1287_p12 = por %p1286_p9, %p1285_p8 }
  0xb8   : > { %p1288_p1 = pnand %p1287_p12, %p1281_p0 }
  0xba   : > { %1291 = shalt.err (!%p1288_p1)  }
  0xbb   : > { %s1292_s20 = scalar_lea.vmem %s220_s15, 16  ;;  %p1297_p4 = scmp.lt.s32.totalorder %s220_s15, %s1902_s24 }
  0xbc   : > { %p1293_p13 = scmp.ne.s32.totalorder %s220_s15, %s1292_s20  ;;  %p1298_p5 = scmp.lt.s32.totalorder %s1930_s18, %s1292_s20 }
  0xbe   : > { %p1299_p6 = por %p1298_p5, %p1297_p4 }
  0xc0   : > { %p1300_p7 = pnand %p1299_p6, %p1293_p13 }
  0xc2   : > { %1303 = shalt.err (!%p1300_p7)  }
  0xc3   : > { %222 = dma.hbm_to_vmem [thread:$0]  %s209_s16, 16, %s220_s15, [#allocation3 + $0x3] }
  0xc4   : > { %s240_s19 = sadd.s32 5, %s1898_s13  ;;  %s1732_s22 = smov [#allocation2 + $0x4]  }
  0xc5   : > { %s236_s11 = sshll.u32 %s1732_s22, 4  ;;  %s241_s23 = sld [smem:[#allocation6 + %s240_s19]]  ;;  %s237_s11 = int_to_ptr.vmem [resolvable:$true] %s236_s11 }
  0xc6   : > { %s1733_s29 = smov [#allocation2 + $0x5]   ;;  %s257_s10 = sadd.s32 6, %s1898_s13 }
  0xc7   : > { %s253_s14 = sshll.u32 %s1733_s29, 4  ;;  %s898_s5 = sshll.u32 %s1971_s17, 4  ;;  %s1982_s14 = int_to_ptr.vmem [resolvable:$true] %s253_s14 }
  0xc8   : > { %s226_s21 = scalar_lea.hbm %s2371_s1, %s898_s5  ;;  %s1987_s15 = sld [smem:[#allocation6 + %s257_s10]] }
  0xc9   : > { %s1304_s16 = scalar_lea.hbm %s226_s21, 16  ;;  %p1307_p11 = scmp.lt.u32.totalorder %s226_s21, %s2371_s1 }
  0xca   : > { %p1305_p10 = scmp.ne.s32.totalorder %s226_s21, %s1304_s16  ;;  %p1308_p0 = scmp.lt.u32.totalorder %s1921_s6, %s1304_s16 }
  0xcb   : > { %p1310_p3 = scmp.lt.u32.totalorder %s1304_s16, %s226_s21 }
  0xcc   : > { %p1309_p2 = por %p1308_p0, %p1307_p11 }
  0xce   : > { %p1311_p8 = por %p1310_p3, %p1309_p2 }
  0xd0   : > { %p1312_p9 = pnand %p1311_p8, %p1305_p10 }
  0xd2   : > { %1315 = shalt.err (!%p1312_p9)  }
  0xd3   : > { %s1316_s17 = scalar_lea.vmem %s237_s11, 16  ;;  %p1321_p1 = scmp.lt.s32.totalorder %s237_s11, %s1902_s24 }
  0xd4   : > { %p1317_p12 = scmp.ne.s32.totalorder %s237_s11, %s1316_s17  ;;  %p1322_p13 = scmp.lt.s32.totalorder %s1930_s18, %s1316_s17 }
  0xd6   : > { %p1323_p4 = por %p1322_p13, %p1321_p1 }
  0xd8   : > { %p1324_p5 = pnand %p1323_p4, %p1317_p12 }
  0xda   : > { %1327 = shalt.err (!%p1324_p5)  }
  0xdb   : > { %239 = dma.hbm_to_vmem [thread:$0]  %s226_s21, 16, %s237_s11, [#allocation3 + $0x4] }
  0xdc   : > { %s899_s19 = sshll.u32 %s241_s23, 4  ;;  %s1734_s10 = smov [#allocation2 + $0x6]  }
  0xdd   : > { %s243_s29 = scalar_lea.hbm %s2371_s1, %s899_s19  ;;  %s270_s5 = sshll.u32 %s1734_s10, 4  ;;  %s271_s5 = int_to_ptr.vmem [resolvable:$true] %s270_s5 }
  0xde   : > { %s1328_s2 = scalar_lea.hbm %s243_s29, 16  ;;  %p1331_p7 = scmp.lt.u32.totalorder %s243_s29, %s2371_s1 }
  0xdf   : > { %p1329_p6 = scmp.ne.s32.totalorder %s243_s29, %s1328_s2  ;;  %p1332_p10 = scmp.lt.u32.totalorder %s1921_s6, %s1328_s2 }
  0xe0   : > { %p1334_p0 = scmp.lt.u32.totalorder %s1328_s2, %s243_s29 }
  0xe1   : > { %p1333_p11 = por %p1332_p10, %p1331_p7 }
  0xe3   : > { %p1335_p2 = por %p1334_p0, %p1333_p11 }
  0xe5   : > { %p1336_p3 = pnand %p1335_p2, %p1329_p6 }
  0xe7   : > { %1339 = shalt.err (!%p1336_p3)  }
  0xe8   : > { %s1340_s11 = scalar_lea.vmem %s1982_s14, 16  ;;  %p1345_p9 = scmp.lt.s32.totalorder %s1982_s14, %s1902_s24 }
  0xe9   : > { %p1341_p8 = scmp.ne.s32.totalorder %s1982_s14, %s1340_s11  ;;  %p1346_p12 = scmp.lt.s32.totalorder %s1930_s18, %s1340_s11 }
  0xeb   : > { %p1347_p1 = por %p1346_p12, %p1345_p9 }
  0xed   : > { %p1348_p13 = pnand %p1347_p1, %p1341_p8 }
  0xef   : > { %1351 = shalt.err (!%p1348_p13)  }
  0xf0   : > { %256 = dma.hbm_to_vmem [thread:$0]  %s243_s29, 16, %s1982_s14, [#allocation3 + $0x5] }
  0xf1   : > { %s2378_s23 = sand.u32 1, %s1708_s26   ;;  %s900_s21 = sshll.u32 %s1987_s15, 4 }
  0xf2   : > { %s2012_s20 = sshll.u32 %s2378_s23, 3  ;;  %s260_s3 = scalar_lea.hbm %s2371_s1, %s900_s21 }
  0xf3   : > { %s1352_s22 = scalar_lea.hbm %s260_s3, 16  ;;  %p1355_p5 = scmp.lt.u32.totalorder %s260_s3, %s2371_s1 }
  0xf4   : > { %p1353_p4 = scmp.ne.s32.totalorder %s260_s3, %s1352_s22  ;;  %p1356_p6 = scmp.lt.u32.totalorder %s1921_s6, %s1352_s22 }
  0xf5   : > { %p1358_p10 = scmp.lt.u32.totalorder %s1352_s22, %s260_s3 }
  0xf6   : > { %p1357_p7 = por %p1356_p6, %p1355_p5 }
  0xf8   : > { %p1359_p11 = por %p1358_p10, %p1357_p7 }
  0xfa   : > { %p1360_p0 = pnand %p1359_p11, %p1353_p4 }
  0xfc   : > { %1363 = shalt.err (!%p1360_p0)  }
  0xfd   : > { %s1364_s14 = scalar_lea.vmem %s271_s5, 16  ;;  %p1369_p3 = scmp.lt.s32.totalorder %s271_s5, %s1902_s24 }
  0xfe   : > { %p1365_p2 = scmp.ne.s32.totalorder %s271_s5, %s1364_s14  ;;  %p1370_p8 = scmp.lt.s32.totalorder %s1930_s18, %s1364_s14 }
 0x100   : > { %p1371_p9 = por %p1370_p8, %p1369_p3 }
 0x102   : > { %p1372_p12 = pnand %p1371_p9, %p1365_p2 }
 0x104   : > { %1375 = shalt.err (!%p1372_p12)  }
 0x105   : > { %273 = dma.hbm_to_vmem [thread:$0]  %s260_s3, 16, %s271_s5, [#allocation3 + $0x6] }
 0x106   : > { %s274_s15 = sadd.s32 7, %s1898_s13  ;;  %s1735_s12 = smov [#allocation2 + $0x7]  }
 0x107   : > { %s275_s29 = sld [smem:[#allocation6 + %s274_s15]]  ;;  %s287_s16 = sshll.u32 %s1735_s12, 4  ;;  %s288_s16 = int_to_ptr.vmem [resolvable:$true] %s287_s16 }
 0x10d   : > { %s901_s11 = sshll.u32 %s275_s29, 4 }
 0x10e   : > { %s277_s19 = scalar_lea.hbm %s2371_s1, %s901_s11 }
 0x10f   : > { %s1376_s22 = scalar_lea.hbm %s277_s19, 16  ;;  %p1379_p13 = scmp.lt.u32.totalorder %s277_s19, %s2371_s1 }
 0x110   : > { %p1377_p1 = scmp.ne.s32.totalorder %s277_s19, %s1376_s22  ;;  %p1380_p4 = scmp.lt.u32.totalorder %s1921_s6, %s1376_s22 }
 0x111   : > { %p1382_p6 = scmp.lt.u32.totalorder %s1376_s22, %s277_s19 }
 0x112   : > { %p1381_p5 = por %p1380_p4, %p1379_p13 }
 0x114   : > { %p1383_p7 = por %p1382_p6, %p1381_p5 }
 0x116   : > { %p1384_p10 = pnand %p1383_p7, %p1377_p1 }
 0x118   : > { %1387 = shalt.err (!%p1384_p10)  }
 0x119   : > { %s1388_s5 = scalar_lea.vmem %s288_s16, 16  ;;  %p1393_p0 = scmp.lt.s32.totalorder %s288_s16, %s1902_s24 }
 0x11a   : > { %p1389_p11 = scmp.ne.s32.totalorder %s288_s16, %s1388_s5  ;;  %p1394_p2 = scmp.lt.s32.totalorder %s1930_s18, %s1388_s5 }
 0x11c   : > { %p1395_p3 = por %p1394_p2, %p1393_p0 }
 0x11e   : > { %p1396_p8 = pnand %p1395_p3, %p1389_p11 }
 0x120   : > { %1399 = shalt.err (!%p1396_p8)  }
 0x121   : > { %290 = dma.hbm_to_vmem [thread:$0]  %s277_s19, 16, %s288_s16, [#allocation3 + $0x7] }
 0x122   : > { %s2034_s14 = smov 0  }
 0x123 LB: >> { %s297_s15 = sand.u32 1, %s1720_s14  ;;  %s1720_s14 = sphi %s2034_s14, %s2410_s14  }
 0x124   : >> { %s2040_s29 = sshll.u32 %s297_s15, 3 }
 0x125   : >> { %s299_s12 = scalar_lea.sflag [#allocation3], %s2040_s29 }
 0x126   : >> { %1682 = dma.done.wait %s299_s12, 16 }
 0x127   : >> { %1683 = vsyncadd %s299_s12, 4294967280  ;;  %s756_s11 = scalar_lea.sflag %s299_s12, 1 [#allocation3] }
 0x128   : >> { %1684 = dma.done.wait %s756_s11, 16 }
 0x129   : >> { %1685 = vsyncadd %s756_s11, 4294967280  ;;  %s759_s16 = scalar_lea.sflag %s299_s12, 2 [#allocation3] }
 0x12a   : >> { %1686 = dma.done.wait %s759_s16, 16 }
 0x12b   : >> { %1687 = vsyncadd %s759_s16, 4294967280  ;;  %s762_s21 = scalar_lea.sflag %s299_s12, 3 [#allocation3] }
 0x12c   : >> { %1688 = dma.done.wait %s762_s21, 16 }
 0x12d   : >> { %1689 = vsyncadd %s762_s21, 4294967280  ;;  %s765_s17 = scalar_lea.sflag %s299_s12, 4 [#allocation3] }
 0x12e   : >> { %1690 = dma.done.wait %s765_s17, 16 }
 0x12f   : >> { %1691 = vsyncadd %s765_s17, 4294967280  ;;  %s768_s19 = scalar_lea.sflag %s299_s12, 5 [#allocation3] }
 0x130   : >> { %1692 = dma.done.wait %s768_s19, 16 }
 0x131   : >> { %1693 = vsyncadd %s768_s19, 4294967280  ;;  %s771_s22 = scalar_lea.sflag %s299_s12, 6 [#allocation3] }
 0x132   : >> { %1694 = dma.done.wait %s771_s22, 16 }
 0x133   : >> { %1695 = vsyncadd %s771_s22, 4294967280  ;;  %s774_s10 = scalar_lea.sflag %s299_s12, 7 [#allocation3] }
 0x134   : >> { %1696 = dma.done.wait %s774_s10, 16 }
 0x135   : >> { %1697 = vsyncadd %s774_s10, 4294967280  ;;  %s2406_s13 = sld [smem:[#allocation73_spill]]  ;;  %s2044_s2 = sadd.s32 1, %s1720_s14  }
 0x136   : >> { %s336_s5 = ssub.s32 1, %s297_s15  ;;  %p1084_p12 = scmp.lt.s32.totalorder %s2044_s2, 12 }
 0x137   : >> { %s956_s11 = sshll.u32 %s1720_s14, 4  ;;  %s913_s16 = sshll.u32 %s336_s5, 3 }
 0x138   : >> { %s957_s21 = sadd.s32 16, %s956_s11  ;;  %s2057_s22 = scalar_lea.vmem [#allocation2], %s913_s16 }
 0x139   : >> { %s1043_s17 = scalar_select %p1084_p12, [#allocation6], [#allocation47] }
 0x13a   : >> { %s352_s15 = sshll.u32 %s2057_s22, 4  ;;  %s785_s5 = scalar_lea.vmem %s2057_s22, 1 [#allocation2]  ;;  %s2061_s15 = int_to_ptr.vmem [resolvable:$true] %s352_s15 }
 0x13b   : >> { %s2050_s12 = sadd.s32 %s957_s21, %s2406_s13  ;;  %s2068_s11 = scalar_lea.sflag [#allocation3], %s913_s16 }
 0x13c   : >> { %s1044_s19 = scalar_select %p1084_p12, %s2050_s12, 0 }
 0x13d   : >> { %s356_s10 = sadd.s32 1, %s2050_s12  ;;  %s370_s13 = sshll.u32 %s785_s5, 4  ;;  %s2073_s13 = int_to_ptr.vmem [resolvable:$true] %s370_s13 }
 0x13e   : >> { %s339_s23 = sld [smem:[%s1043_s17 + %s1044_s19]]  ;;  %s2426_s10 = smov (!%p1084_p12, %s356_s10), 0 }
 0x13f   : >> { %s1046_s14 = scalar_select %p1084_p12, [#allocation6], [#allocation48] }
 0x140   : >> { %s374_s17 = sadd.s32 2, %s2050_s12  ;;  %s793_s7 = scalar_lea.vmem %s2057_s22, 2 [#allocation2] }
 0x141   : >> { %s2071_s3 = sld [smem:[%s1046_s14 + %s2426_s10]]  ;;  %s796_s25 = scalar_lea.sflag %s2068_s11, 2 [#allocation3] }
 0x144   : >> { %s912_s19 = sshll.u32 %s339_s23, 4 }
 0x145   : >> { %s341_s9 = scalar_lea.hbm %s2371_s1, %s912_s19 }
 0x146   : >> { %s1400_s28 = scalar_lea.hbm %s341_s9, 16  ;;  %p1405_p5 = scmp.lt.u32.totalorder %s341_s9, %s2371_s1 }
 0x147   : >> { %p1401_p1 = scmp.ne.s32.totalorder %s341_s9, %s1400_s28  ;;  %p1406_p6 = scmp.lt.u32.totalorder %s1921_s6, %s1400_s28 }
 0x148   : >> { %p1408_p10 = scmp.lt.u32.totalorder %s1400_s28, %s341_s9 }
 0x149   : >> { %p1402_p13 = pnand %p1401_p1, %p1084_p12  ;;  %p1407_p7 = por %p1406_p6, %p1405_p5 }
 0x14b   : >> { %p1403_p4 = pneg %p1402_p13  ;;  %p1409_p11 = por %p1408_p10, %p1407_p7 }
 0x14d   : >> { %p1410_p0 = pnand %p1409_p11, %p1403_p4 }
 0x14f   : >> { %1413 = shalt.err (!%p1410_p0)  }
 0x150   : >> { %s1414_s27 = scalar_lea.vmem %s2061_s15, 16  ;;  %p1421_p1 = scmp.lt.s32.totalorder %s2061_s15, %s1902_s24 }
 0x151   : >> { %p1415_p2 = scmp.ne.s32.totalorder %s2061_s15, %s1414_s27  ;;  %p1422_p13 = scmp.lt.s32.totalorder %s1930_s18, %s1414_s27 }
 0x153   : >> { %p1416_p3 = pnand %p1415_p2, %p1084_p12  ;;  %p1423_p9 = por %p1422_p13, %p1421_p1 }
 0x155   : >> { %p1417_p8 = pneg %p1416_p3 }
 0x157   : >> { %p1424_p5 = pnand %p1423_p9, %p1417_p8 }
 0x159   : >> { %1427 = shalt.err (!%p1424_p5)  }
 0x15a   : >> { %1045 = dma.hbm_to_vmem [thread:$0]  (%p1084_p12), %s341_s9, 16, %s2061_s15, %s2068_s11 }
 0x15b   : >> { %s2100_s28 = scalar_select %p1084_p12, [#allocation6], [#allocation49] }
 0x15c   : >> { %s914_s30 = sshll.u32 %s2071_s3, 4  ;;  %s388_s23 = sshll.u32 %s793_s7, 4  ;;  %s2106_s23 = int_to_ptr.vmem [resolvable:$true] %s388_s23 }
 0x15d   : >> { %s359_s5 = scalar_lea.hbm %s2371_s1, %s914_s30 }
 0x15e   : >> { %s1428_s21 = scalar_lea.hbm %s359_s5, 16  ;;  %p1433_p7 = scmp.lt.u32.totalorder %s359_s5, %s2371_s1 }
 0x15f   : >> { %p1429_p9 = scmp.ne.s32.totalorder %s359_s5, %s1428_s21  ;;  %p1434_p10 = scmp.lt.u32.totalorder %s1921_s6, %s1428_s21 }
 0x160   : >> { %p1436_p0 = scmp.lt.u32.totalorder %s1428_s21, %s359_s5 }
 0x161   : >> { %p1430_p4 = pnand %p1429_p9, %p1084_p12  ;;  %p1435_p11 = por %p1434_p10, %p1433_p7 }
 0x163   : >> { %p1431_p6 = pneg %p1430_p4  ;;  %p1437_p2 = por %p1436_p0, %p1435_p11 }
 0x165   : >> { %p1438_p3 = pnand %p1437_p2, %p1431_p6 }
 0x167   : >> { %1441 = shalt.err (!%p1438_p3)  }
 0x168   : >> { %s1442_s7 = scalar_lea.vmem %s2073_s13, 16  ;;  %p1449_p5 = scmp.lt.s32.totalorder %s2073_s13, %s1902_s24 }
 0x169   : >> { %p1443_p8 = scmp.ne.s32.totalorder %s2073_s13, %s1442_s7  ;;  %p1450_p9 = scmp.lt.s32.totalorder %s1930_s18, %s1442_s7 }
 0x16b   : >> { %p1444_p1 = pnand %p1443_p8, %p1084_p12  ;;  %p1451_p4 = por %p1450_p9, %p1449_p5 }
 0x16d   : >> { %p1445_p13 = pneg %p1444_p1 }
 0x16f   : >> { %p1452_p7 = pnand %p1451_p4, %p1445_p13 }
 0x171   : >> { %1455 = shalt.err (!%p1452_p7)  }
 0x172   : >> { %s2407_s9 = scalar_lea.sflag %s2068_s11, 1 [#allocation3]  ;;  %s2428_s17 = smov (!%p1084_p12, %s374_s17), 0 }
 0x173   : >> { %1048 = dma.hbm_to_vmem [thread:$0]  (%p1084_p12), %s359_s5, 16, %s2073_s13, %s2407_s9 }
 0x174   : >> { %s392_s3 = sadd.s32 3, %s2050_s12  ;;  %s801_s15 = scalar_lea.vmem %s2057_s22, 3 [#allocation2] }
 0x175   : >> { %s375_s27 = sld [smem:[%s2100_s28 + %s2428_s17]]  ;;  %s2430_s3 = smov (!%p1084_p12, %s392_s3), 0 }
 0x176   : >> { %s1052_s10 = scalar_select %p1084_p12, [#allocation6], [#allocation50] }
 0x177   : >> { %s406_s14 = sshll.u32 %s801_s15, 4  ;;  %s410_s21 = sadd.s32 4, %s2050_s12  ;;  %s2141_s14 = int_to_ptr.vmem [resolvable:$true] %s406_s14 }
 0x178   : >> { %s2139_s19 = sld [smem:[%s1052_s10 + %s2430_s3]]  ;;  %s809_s16 = scalar_lea.vmem %s2057_s22, 4 [#allocation2] }
 0x179   : >> { %s2145_s13 = scalar_select %p1084_p12, [#allocation6], [#allocation51] }
 0x17b   : >> { %s917_s5 = sshll.u32 %s375_s27, 4 }
 0x17c   : >> { %s377_s17 = scalar_lea.hbm %s2371_s1, %s917_s5 }
 0x17d   : >> { %s1456_s30 = scalar_lea.hbm %s377_s17, 16  ;;  %p1461_p0 = scmp.lt.u32.totalorder %s377_s17, %s2371_s1 }
 0x17e   : >> { %p1457_p6 = scmp.ne.s32.totalorder %s377_s17, %s1456_s30  ;;  %p1462_p2 = scmp.lt.u32.totalorder %s1921_s6, %s1456_s30 }
 0x17f   : >> { %p1464_p8 = scmp.lt.u32.totalorder %s1456_s30, %s377_s17 }
 0x180   : >> { %p1458_p10 = pnand %p1457_p6, %p1084_p12  ;;  %p1463_p3 = por %p1462_p2, %p1461_p0 }
 0x182   : >> { %p1459_p11 = pneg %p1458_p10  ;;  %p1465_p1 = por %p1464_p8, %p1463_p3 }
 0x184   : >> { %p1466_p13 = pnand %p1465_p1, %p1459_p11 }
 0x186   : >> { %1469 = shalt.err (!%p1466_p13)  }
 0x187   : >> { %s1470_s27 = scalar_lea.vmem %s2106_s23, 16  ;;  %p1477_p7 = scmp.lt.s32.totalorder %s2106_s23, %s1902_s24 }
 0x188   : >> { %p1471_p5 = scmp.ne.s32.totalorder %s2106_s23, %s1470_s27  ;;  %p1478_p6 = scmp.lt.s32.totalorder %s1930_s18, %s1470_s27 }
 0x18a   : >> { %p1472_p9 = pnand %p1471_p5, %p1084_p12  ;;  %p1479_p10 = por %p1478_p6, %p1477_p7 }
 0x18c   : >> { %p1473_p4 = pneg %p1472_p9 }
 0x18e   : >> { %p1480_p0 = pnand %p1479_p10, %p1473_p4 }
 0x190   : >> { %1483 = shalt.err (!%p1480_p0)  }
 0x191   : >> { %1051 = dma.hbm_to_vmem [thread:$0]  (%p1084_p12), %s377_s17, 16, %s2106_s23, %s796_s25 }
 0x192   : >> { %s2432_s21 = smov (!%p1084_p12, %s410_s21), 0  ;;  %s920_s30 = sshll.u32 %s2139_s19, 4 }
 0x193   : >> { %s424_s10 = sshll.u32 %s809_s16, 4  ;;  %s395_s9 = scalar_lea.hbm %s2371_s1, %s920_s30  ;;  %s2199_s10 = int_to_ptr.vmem [resolvable:$true] %s424_s10 }
 0x194   : >> { %s2179_s15 = sld [smem:[%s2145_s13 + %s2432_s21]]  ;;  %s1484_s3 = scalar_lea.hbm %s395_s9, 16 }
 0x195   : >> { %p1485_p11 = scmp.ne.s32.totalorder %s395_s9, %s1484_s3  ;;  %p1489_p8 = scmp.lt.u32.totalorder %s395_s9, %s2371_s1 }
 0x196   : >> { %p1490_p1 = scmp.lt.u32.totalorder %s1921_s6, %s1484_s3  ;;  %p1492_p5 = scmp.lt.u32.totalorder %s1484_s3, %s395_s9 }
 0x197   : >> { %p1486_p2 = pnand %p1485_p11, %p1084_p12 }
 0x198   : >> { %p1491_p13 = por %p1490_p1, %p1489_p8 }
 0x199   : >> { %p1487_p3 = pneg %p1486_p2 }
 0x19a   : >> { %p1493_p9 = por %p1492_p5, %p1491_p13 }
 0x19c   : >> { %p1494_p4 = pnand %p1493_p9, %p1487_p3 }
 0x19e   : >> { %1497 = shalt.err (!%p1494_p4)  }
 0x19f   : >> { %s1498_s25 = scalar_lea.vmem %s2141_s14, 16  ;;  %p1505_p0 = scmp.lt.s32.totalorder %s2141_s14, %s1902_s24 }
 0x1a0   : >> { %p1499_p7 = scmp.ne.s32.totalorder %s2141_s14, %s1498_s25  ;;  %p1506_p11 = scmp.lt.s32.totalorder %s1930_s18, %s1498_s25 }
 0x1a2   : >> { %p1500_p6 = pnand %p1499_p7, %p1084_p12  ;;  %p1507_p2 = por %p1506_p11, %p1505_p0 }
 0x1a4   : >> { %p1501_p10 = pneg %p1500_p6 }
 0x1a6   : >> { %p1508_p1 = pnand %p1507_p2, %p1501_p10 }
 0x1a8   : >> { %1511 = shalt.err (!%p1508_p1)  }
 0x1a9   : >> { %s2408_s23 = scalar_lea.sflag %s2068_s11, 3 [#allocation3]  ;;  %s428_s21 = sadd.s32 5, %s2050_s12 }
 0x1aa   : >> { %1054 = dma.hbm_to_vmem [thread:$0]  (%p1084_p12), %s395_s9, 16, %s2141_s14, %s2408_s23 }
 0x1ab   : >> { %s1058_s19 = scalar_select %p1084_p12, [#allocation6], [#allocation52] }
 0x1ac   : >> { %s2434_s21 = smov (!%p1084_p12, %s428_s21), 0  ;;  %s817_s13 = scalar_lea.vmem %s2057_s22, 5 [#allocation2] }
 0x1ad   : >> { %s820_s16 = scalar_lea.sflag %s2068_s11, 5 [#allocation3]  ;;  %s923_s17 = sshll.u32 %s2179_s15, 4 }
 0x1ae   : >> { %s2209_s28 = sld [smem:[%s1058_s19 + %s2434_s21]]  ;;  %s413_s7 = scalar_lea.hbm %s2371_s1, %s923_s17 }
 0x1af   : >> { %s442_s3 = sshll.u32 %s817_s13, 4  ;;  %s1512_s27 = scalar_lea.hbm %s413_s7, 16  ;;  %s2232_s3 = int_to_ptr.vmem [resolvable:$true] %s442_s3 }
 0x1b0   : >> { %p1513_p3 = scmp.ne.s32.totalorder %s413_s7, %s1512_s27  ;;  %p1517_p5 = scmp.lt.u32.totalorder %s413_s7, %s2371_s1 }
 0x1b1   : >> { %p1518_p9 = scmp.lt.u32.totalorder %s1921_s6, %s1512_s27  ;;  %p1520_p7 = scmp.lt.u32.totalorder %s1512_s27, %s413_s7 }
 0x1b2   : >> { %p1514_p8 = pnand %p1513_p3, %p1084_p12 }
 0x1b3   : >> { %p1519_p4 = por %p1518_p9, %p1517_p5 }
 0x1b4   : >> { %p1515_p13 = pneg %p1514_p8 }
 0x1b5   : >> { %p1521_p6 = por %p1520_p7, %p1519_p4 }
 0x1b7   : >> { %p1522_p10 = pnand %p1521_p6, %p1515_p13 }
 0x1b9   : >> { %1525 = shalt.err (!%p1522_p10)  }
 0x1ba   : >> { %s1526_s15 = scalar_lea.vmem %s2199_s10, 16  ;;  %p1533_p1 = scmp.lt.s32.totalorder %s2199_s10, %s1902_s24 }
 0x1bb   : >> { %p1527_p0 = scmp.ne.s32.totalorder %s2199_s10, %s1526_s15  ;;  %p1534_p3 = scmp.lt.s32.totalorder %s1930_s18, %s1526_s15 }
 0x1bd   : >> { %p1528_p11 = pnand %p1527_p0, %p1084_p12  ;;  %p1535_p8 = por %p1534_p3, %p1533_p1 }
 0x1bf   : >> { %p1529_p2 = pneg %p1528_p11 }
 0x1c1   : >> { %p1536_p5 = pnand %p1535_p8, %p1529_p2 }
 0x1c3   : >> { %1539 = shalt.err (!%p1536_p5)  }
 0x1c4   : >> { %s2409_s25 = scalar_lea.sflag %s2068_s11, 4 [#allocation3]  ;;  %s446_s23 = sadd.s32 6, %s2050_s12 }
 0x1c5   : >> { %1057 = dma.hbm_to_vmem [thread:$0]  (%p1084_p12), %s413_s7, 16, %s2199_s10, %s2409_s25 }
 0x1c6   : >> { %s1061_s21 = scalar_select %p1084_p12, [#allocation6], [#allocation53] }
 0x1c7   : >> { %s2436_s23 = smov (!%p1084_p12, %s446_s23), 0  ;;  %s926_s19 = sshll.u32 %s2209_s28, 4 }
 0x1c8   : >> { %s825_s13 = scalar_lea.vmem %s2057_s22, 6 [#allocation2]  ;;  %s431_s5 = scalar_lea.hbm %s2371_s1, %s926_s19 }
 0x1c9   : >> { %s2244_s27 = sld [smem:[%s1061_s21 + %s2436_s23]]  ;;  %s1540_s14 = scalar_lea.hbm %s431_s5, 16 }
 0x1ca   : >> { %p1541_p13 = scmp.ne.s32.totalorder %s431_s5, %s1540_s14  ;;  %p1545_p7 = scmp.lt.u32.totalorder %s431_s5, %s2371_s1 }
 0x1cb   : >> { %p1546_p6 = scmp.lt.u32.totalorder %s1921_s6, %s1540_s14  ;;  %p1548_p0 = scmp.lt.u32.totalorder %s1540_s14, %s431_s5 }
 0x1cc   : >> { %p1542_p9 = pnand %p1541_p13, %p1084_p12 }
 0x1cd   : >> { %p1547_p10 = por %p1546_p6, %p1545_p7 }
 0x1ce   : >> { %p1543_p4 = pneg %p1542_p9 }
 0x1cf   : >> { %p1549_p11 = por %p1548_p0, %p1547_p10 }
 0x1d1   : >> { %p1550_p2 = pnand %p1549_p11, %p1543_p4 }
 0x1d3   : >> { %1553 = shalt.err (!%p1550_p2)  }
 0x1d4   : >> { %s1554_s28 = scalar_lea.vmem %s2232_s3, 16  ;;  %p1561_p5 = scmp.lt.s32.totalorder %s2232_s3, %s1902_s24 }
 0x1d5   : >> { %p1555_p1 = scmp.ne.s32.totalorder %s2232_s3, %s1554_s28  ;;  %p1562_p13 = scmp.lt.s32.totalorder %s1930_s18, %s1554_s28 }
 0x1d7   : >> { %p1556_p3 = pnand %p1555_p1, %p1084_p12  ;;  %p1563_p9 = por %p1562_p13, %p1561_p5 }
 0x1d9   : >> { %p1557_p8 = pneg %p1556_p3 }
 0x1db   : >> { %p1564_p6 = pnand %p1563_p9, %p1557_p8 }
 0x1dd   : >> { %1567 = shalt.err (!%p1564_p6)  }
 0x1de   : >> { %1060 = dma.hbm_to_vmem [thread:$0]  (%p1084_p12), %s431_s5, 16, %s2232_s3, %s820_s16 }
 0x1df   : >> { %s828_s9 = scalar_lea.sflag %s2068_s11, 6 [#allocation3]  ;;  %s460_s15 = sshll.u32 %s825_s13, 4  ;;  %s2265_s15 = int_to_ptr.vmem [resolvable:$true] %s460_s15 }
 0x1e0   : >> { %s464_s25 = sadd.s32 7, %s2050_s12  ;;  %s929_s21 = sshll.u32 %s2244_s27, 4 }
 0x1e1   : >> { %s1064_s23 = scalar_select %p1084_p12, [#allocation6], [#allocation54] }
 0x1e2   : >> { %s2438_s25 = smov (!%p1084_p12, %s464_s25), 0  ;;  %s833_s19 = scalar_lea.vmem %s2057_s22, 7 [#allocation2] }
 0x1e3   : >> { %s449_s14 = scalar_lea.hbm %s2371_s1, %s929_s21  ;;  %s465_s10 = sld [smem:[%s1064_s23 + %s2438_s25]] }
 0x1e4   : >> { %s1568_s7 = scalar_lea.hbm %s449_s14, 16  ;;  %p1573_p0 = scmp.lt.u32.totalorder %s449_s14, %s2371_s1 }
 0x1e5   : >> { %p1569_p4 = scmp.ne.s32.totalorder %s449_s14, %s1568_s7  ;;  %p1574_p11 = scmp.lt.u32.totalorder %s1921_s6, %s1568_s7 }
 0x1e6   : >> { %p1576_p1 = scmp.lt.u32.totalorder %s1568_s7, %s449_s14 }
 0x1e7   : >> { %p1570_p7 = pnand %p1569_p4, %p1084_p12  ;;  %p1575_p2 = por %p1574_p11, %p1573_p0 }
 0x1e9   : >> { %p1571_p10 = pneg %p1570_p7  ;;  %p1577_p3 = por %p1576_p1, %p1575_p2 }
 0x1eb   : >> { %p1578_p8 = pnand %p1577_p3, %p1571_p10 }
 0x1ed   : >> { %1581 = shalt.err (!%p1578_p8)  }
 0x1ee   : >> { %s1582_s12 = scalar_lea.vmem %s2265_s15, 16  ;;  %p1589_p6 = scmp.lt.s32.totalorder %s2265_s15, %s1902_s24 }
 0x1ef   : >> { %p1583_p5 = scmp.ne.s32.totalorder %s2265_s15, %s1582_s12  ;;  %p1590_p4 = scmp.lt.s32.totalorder %s1930_s18, %s1582_s12 }
 0x1f1   : >> { %p1584_p13 = pnand %p1583_p5, %p1084_p12  ;;  %p1591_p7 = por %p1590_p4, %p1589_p6 }
 0x1f3   : >> { %p1585_p9 = pneg %p1584_p13 }
 0x1f5   : >> { %p1592_p0 = pnand %p1591_p7, %p1585_p9 }
 0x1f7   : >> { %1595 = shalt.err (!%p1592_p0)  }
 0x1f8   : >> { %1063 = dma.hbm_to_vmem [thread:$0]  (%p1084_p12), %s449_s14, 16, %s2265_s15, %s828_s9 }
 0x1f9   : >> { %s478_s22 = sshll.u32 %s833_s19, 4  ;;  %s836_s13 = scalar_lea.sflag %s2068_s11, 7 [#allocation3]  ;;  %s479_s22 = int_to_ptr.vmem [resolvable:$true] %s478_s22 }
 0x1fa   : >> { %s932_s5 = sshll.u32 %s465_s10, 4 }
 0x1fb   : >> { %s467_s25 = scalar_lea.hbm %s2371_s1, %s932_s5 }
 0x1fc   : >> { %s1596_s23 = scalar_lea.hbm %s467_s25, 16  ;;  %p1601_p1 = scmp.lt.u32.totalorder %s467_s25, %s2371_s1 }
 0x1fd   : >> { %p1597_p10 = scmp.ne.s32.totalorder %s467_s25, %s1596_s23  ;;  %p1602_p3 = scmp.lt.u32.totalorder %s1921_s6, %s1596_s23 }
 0x1fe   : >> { %p1604_p5 = scmp.lt.u32.totalorder %s1596_s23, %s467_s25 }
 0x1ff   : >> { %p1598_p11 = pnand %p1597_p10, %p1084_p12  ;;  %p1603_p8 = por %p1602_p3, %p1601_p1 }
 0x201   : >> { %p1599_p2 = pneg %p1598_p11  ;;  %p1605_p13 = por %p1604_p5, %p1603_p8 }
 0x203   : >> { %p1606_p9 = pnand %p1605_p13, %p1599_p2 }
 0x205   : >> { %1609 = shalt.err (!%p1606_p9)  }
 0x206   : >> { %s1610_s11 = scalar_lea.vmem %s479_s22, 16  ;;  %p1617_p0 = scmp.lt.s32.totalorder %s479_s22, %s1902_s24 }
 0x207   : >> { %p1611_p6 = scmp.ne.s32.totalorder %s479_s22, %s1610_s11  ;;  %p1618_p10 = scmp.lt.s32.totalorder %s1930_s18, %s1610_s11 }
 0x209   : >> { %p1612_p4 = pnand %p1611_p6, %p1084_p12  ;;  %p1619_p11 = por %p1618_p10, %p1617_p0 }
 0x20b   : >> { %p1613_p7 = pneg %p1612_p4 }
 0x20d   : >> { %p1620_p1 = pnand %p1619_p11, %p1613_p7 }
 0x20f   : >> { %1623 = shalt.err (!%p1620_p1)  }
 0x210   : >> { %1066 = dma.hbm_to_vmem [thread:$0]  (%p1084_p12), %s467_s25, 16, %s479_s22, %s836_s13  ;;  %v482_v1 = vld [vmem:[#allocation4] sm:$0xff] }
 0x211   : >> { %s483_s9 = scalar_lea.vmem [#allocation2], %s2040_s29  ;;  %s2410_s14 = smov %s2044_s2 }
 0x212   : >> { %v484_v2 = vld [vmem:[%s483_s9] sm:$0xff]  ;;  %p2411_p2 = scmp.ge.s32.totalorder %s2044_s2, 12 }
 0x213   : >> { %v485_v3 = vadd.f32 %v484_v2, %v482_v1  ;;  %v489_v4 = vld [vmem:[#allocation7] sm:$0xff] (%p2411_p2)  ;;  %v490_v5 = vld [vmem:[#allocation7 + $0x8] sm:$0xff] (%p2411_p2)  ;;  %v491_v6 = vld [vmem:[#allocation7 + $0x10] sm:$0xff] (%p2411_p2)  ;;  %v1736_v7 = vmov (%p2411_p2), 0.0|0.0   ;;  %vm1737_vm0 = vmmov (%p2411_p2), 0   ;;  %s937_s24 = sshll.u32 (%p2411_p2), %s1797_s0, 7 }
 0x214   : > { %295 = sbr.rel (!%p2411_p2) target bundleno = 291 (0x123), region = 214  ;;  %1010 = vmatprep.subr.bf16.mxu0 (%p2411_p2), %v1736_v7  ;;  %v1011_v8 = vpack.c.bf16 (%p2411_p2), %v490_v5, %v489_v4  ;;  %v492_v9 = vld [vmem:[#allocation7 + $0x18] sm:$0xff] (%p2411_p2)  ;;  %1007 = vmatprep.mubr.msk.f32.mxu0 (%p2411_p2), %vm1737_vm0, %v1728_v0  ;;  %v493_v11 = vld [vmem:[#allocation7 + $0x20] sm:$0xff] (%p2411_p2)  ;;  %v494_v12 = vld [vmem:[#allocation7 + $0x28] sm:$0xff] (%p2411_p2)  ;;  %s2412_s6 = scalar_lea.vmem (%p2411_p2), [#allocation12], %s2012_s20 }
 0x215   : >> { %486 = vst [vmem:[#allocation4] sm:$0xff] %v485_v3  ;;  %v1014_v10 = vpack.c.bf16 (%p2411_p2), %v492_v9, %v491_v6  ;;  %v1017_v13 = vpack.c.bf16 (%p2411_p2), %v494_v12, %v493_v11  ;;  %v495_v14 = vld [vmem:[#allocation7 + $0x30] sm:$0xff] (%p2411_p2)  ;;  %v496_v15 = vld [vmem:[#allocation7 + $0x38] sm:$0xff] (%p2411_p2)  ;;  %v497_v17 = vld [vmem:[#allocation7 + $0x40] sm:$0xff] (%p2411_p2)  ;;  %s597_s18 = sshll.u32 (%p2411_p2), %s2412_s6, 4  ;;  %s2324_s15 = scalar_lea.hbm (%p2411_p2), %s2374_s4, %s937_s24  ;;  %s2326_s18 = int_to_ptr.vmem [resolvable:$true] %s597_s18 }
 0x216   : > { %1012 = vmatpush3.bf16.msra.mxu0 (%p2411_p2), %v1011_v8  ;;  %v1020_v16 = vpack.c.bf16 (%p2411_p2), %v496_v15, %v495_v14  ;;  %v498_v18 = vld [vmem:[#allocation7 + $0x48] sm:$0xff] (%p2411_p2)  ;;  %v499_v20 = vld [vmem:[#allocation7 + $0x50] sm:$0xff] (%p2411_p2)  ;;  %v500_v21 = vld [vmem:[#allocation7 + $0x58] sm:$0xff] (%p2411_p2)  ;;  %s2413_s19 = smov (%p2411_p2), %s2412_s6  ;;  %s2414_s30 = sand.u32 (%p2411_p2), 1, %s1708_s26  }
 0x217   : > { %1013 = vmatprep.subr.bf16.mxu0 (%p2411_p2), %v1736_v7  ;;  %v1023_v19 = vpack.c.bf16 (%p2411_p2), %v498_v18, %v497_v17  ;;  %v1026_v22 = vpack.c.bf16 (%p2411_p2), %v500_v21, %v499_v20  ;;  %v501_v23 = vld [vmem:[#allocation7 + $0x60] sm:$0xff] (%p2411_p2)  ;;  %v502_v24 = vld [vmem:[#allocation7 + $0x68] sm:$0xff] (%p2411_p2)  ;;  %v503_v26 = vld [vmem:[#allocation7 + $0x70] sm:$0xff] (%p2411_p2)  ;;  %s584_s14 = scalar_lea.sflag (%p2411_p2), [#allocation9], %s2414_s30  ;;  %s1624_s0 = scalar_lea.vmem (%p2411_p2), %s2326_s18, 128 }
 0x218   : > { %v1029_v25 = vpack.c.bf16 (%p2411_p2), %v502_v24, %v501_v23  ;;  %v504_v27 = vld [vmem:[#allocation7 + $0x78] sm:$0xff] (%p2411_p2)  ;;  %v935_v31 = vld [vmem:[#allocation10] ss:$0 sm:$0xff] (%p2411_p2)  ;;  %p1625_p12 = scmp.ne.s32.totalorder (%p2411_p2), %s2326_s18, %s1624_s0  ;;  %p2415_p3 = scmp.ne.s32.totalorder (%p2411_p2), %s2393_s8, 0 }
 0x219   : > { %v1032_v28 = vpack.c.bf16 (%p2411_p2), %v504_v27, %v503_v26  ;;  %s1738_s10 = smov (%p2411_p2), [#allocation12]  }
 0x21a   : > { %1015 = vmatpush3.bf16.msra.mxu0 (%p2411_p2), %v1014_v10  ;;  %p1626_p8 = pnand (%p2411_p2), %p1625_p12, %p2415_p3  ;;  %s1628_s7 = sshll.u32 (%p2411_p2), %s1738_s10, 4  ;;  %s1629_s7 = int_to_ptr.vmem [resolvable:$false] %s1628_s7 }
 0x21b   : > { %1016 = vmatprep.subr.bf16.mxu0 %v1736_v7  ;;  %s1630_s16 = scalar_lea.vmem %s1629_s7, 256  ;;  %p1631_p13 = scmp.lt.s32.totalorder %s2326_s18, %s1629_s7 }
 0x21c   : > { %v487_v29 = vld [vmem:[#allocation4] sm:$0xff]  ;;  %p1627_p5 = pneg %p1626_p8  ;;  %p1632_p9 = scmp.lt.s32.totalorder %s1630_s16, %s1624_s0 }
 0x21d   : > { %v488_v30 = vmul.f32 0.083333336, %v487_v29 }
 0x21e   : > { %1018 = vmatpush3.bf16.msra.mxu0 %v1017_v13  ;;  %p1633_p6 = por %p1632_p9, %p1631_p13 }
 0x21f   : > { %1019 = vmatprep.subr.bf16.mxu0 %v1736_v7 }
 0x220   : > { %p1634_p4 = pnand %p1633_p6, %p1627_p5 }
 0x222   : > { %1021 = vmatpush3.bf16.msra.mxu0 %v1020_v16 }
 0x223   : > { %1022 = vmatprep.subr.bf16.mxu0 %v1736_v7 }
 0x226   : > { %1024 = vmatpush3.bf16.msra.mxu0 %v1023_v19 }
 0x227   : > { %1025 = vmatprep.subr.bf16.mxu0 %v1736_v7 }
 0x22a   : > { %1027 = vmatpush3.bf16.msra.mxu0 %v1026_v22 }
 0x22b   : > { %1028 = vmatprep.subr.bf16.mxu0 %v1736_v7 }
 0x22e   : > { %1030 = vmatpush3.bf16.msra.mxu0 %v1029_v25 }
 0x22f   : > { %1031 = vmatprep.subr.bf16.mxu0 %v1736_v7 }
 0x232   : > { %1033 = vmatpush3.bf16.msra.mxu0 %v1032_v28 }
 0x235   : > { %1008 = vmatmul.mubr.f32.vlgmr.msra.gmra.mrb[0].mxu0 %v488_v30 }
 0x308   : > { %v578_v32 = vpop.f32.mrb[0].mxu0 }
 0x309   : > { %v579_v33 = vadd.f32 %v935_v31, %v578_v32  ;;  %v1009_v34 = vpop.f32.mrb[1].mxu0 }
 0x30b   : > { %582 = vst [vmem:[%s2413_s19] sm:$0xff] %v579_v33 }
 0x30c   : > { %1637 = shalt.err (!%p1634_p4)
}
 0x30d   : > { %s1638_s20 = scalar_lea.hbm %s2324_s15, 128  ;;  %s1642_s22 = scalar_lea.hbm %s2374_s4, 256 }
 0x30e   : > { %p1639_p7 = scmp.ne.s32.totalorder %s2324_s15, %s1638_s20  ;;  %p1643_p11 = scmp.lt.u32.totalorder %s2324_s15, %s2374_s4 }
 0x30f   : > { %p1644_p1 = scmp.lt.u32.totalorder %s1642_s22, %s1638_s20  ;;  %p1646_p12 = scmp.lt.u32.totalorder %s1638_s20, %s2324_s15 }
 0x310   : > { %p1640_p0 = pnand %p1639_p7, %p2415_p3 }
 0x311   : > { %p1645_p2 = por %p1644_p1, %p1643_p11 }
 0x312   : > { %p1641_p10 = pneg %p1640_p0 }
 0x313   : > { %p1647_p8 = por %p1646_p12, %p1645_p2 }
 0x315   : > { %p1648_p5 = pnand %p1647_p8, %p1641_p10 }
 0x317   : > { %1651 = shalt.err (!%p1648_p5)
}
 0x318   : > { %1067 = dma.vmem_to_hbm [thread:$0]  (%p2415_p3), %s2326_s18, 128, %s2324_s15, %s584_s14  }
 0x319 PF: > { %s2416_s27 = sld [smem:[#allocation69_spill]]  ;;  %s2417_s28 = sld [smem:[#allocation67_spill]] }
 0x31a   : > { %s2418_s25 = sld [smem:[#allocation72_spill]] }
 0x31f   : > { %p1085_p13 = scmp.ge.s32.totalorder %s2416_s27, 2  ;;  %s609_s23 = sand.u32 1, %s2417_s28  }
 0x320   : > { %p2419_p9 = scmp.ne.s32.totalorder %s2418_s25, 0  ;;  %s610_s21 = scalar_lea.sflag [#allocation9], %s609_s23 }
 0x322   : > { %p1077_p6 = pnand %p1085_p13, %p2419_p9 }
 0x324   : > { %1699 = dma.done.wait (!%p1077_p6), %s610_s21, 128  }
 0x325   : > { %1701 = vsyncadd (!%p1077_p6), %s610_s21, 4294967168  ;;  %s2420_s28 = sld [smem:[#allocation70_spill]]  ;;  %s2421_s17 = sld [smem:[#allocation68_spill]] }
 0x326   : > { %s2422_s27 = sld [smem:[#allocation71_spill]]  ;;  %s2423_s25 = smov %s1708_s26 }
 0x32b   : > { %p20_p4 = scmp.ge.s32.totalorder %s2420_s28, 4   ;;  %s2424_s26 = smov %s2421_s17 }
 0x32d   :  { %22 = sbr.rel (!%p20_p4) target bundleno = 18 (0x12), region = 225 }
 0x334   :  { %615 = vsyncpa [#allocation8], 1 }
 0x335   :  { %617 = vsyncpa [#allocation8 + $0x1], 1 }
 0x336   :  { %618 = vsyncpa [#allocation11], 1 }
 0x337   :  { %619 = vsyncpa [#allocation9], 1 }
 0x338   :  { %621 = vsyncpa [#allocation9 + $0x1], 1 }
 0x339   :  { %622 = vsyncmov [#allocation3] }
 0x33c   :  { %s623_s8 = vpop.sfrf %622 }
 0x33d   :  { %p940_p3 = scmp.ne.s32.totalorder %s623_s8, 0 }
 0x33f   :  { %627 = shalt.err (%p940_p3)  }
 0x340   :  { %629 = vsyncmov [#allocation3 + $0x1] }
 0x343   :  { %s630_s11 = vpop.sfrf %629 }
 0x344   :  { %p941_p7 = scmp.ne.s32.totalorder %s630_s11, 0 }
 0x346   :  { %634 = shalt.err (%p941_p7)  }
 0x347   :  { %636 = vsyncmov [#allocation3 + $0x2] }
 0x34a   :  { %s637_s9 = vpop.sfrf %636 }
 0x34b   :  { %p942_p0 = scmp.ne.s32.totalorder %s637_s9, 0 }
 0x34d   :  { %641 = shalt.err (%p942_p0)  }
 0x34e   :  { %643 = vsyncmov [#allocation3 + $0x3] }
 0x351   :  { %s644_s24 = vpop.sfrf %643 }
 0x352   :  { %p943_p10 = scmp.ne.s32.totalorder %s644_s24, 0 }
 0x354   :  { %648 = shalt.err (%p943_p10)  }
 0x355   :  { %650 = vsyncmov [#allocation3 + $0x4] }
 0x358   :  { %s651_s1 = vpop.sfrf %650 }
 0x359   :  { %p944_p11 = scmp.ne.s32.totalorder %s651_s1, 0 }
 0x35b   :  { %655 = shalt.err (%p944_p11)  }
 0x35c   :  { %657 = vsyncmov [#allocation3 + $0x5] }
 0x35f   :  { %s658_s4 = vpop.sfrf %657 }
 0x360   :  { %p945_p1 = scmp.ne.s32.totalorder %s658_s4, 0 }
 0x362   :  { %662 = shalt.err (%p945_p1)  }
 0x363   :  { %664 = vsyncmov [#allocation3 + $0x6] }
 0x366   :  { %s665_s26 = vpop.sfrf %664 }
 0x367   :  { %p946_p2 = scmp.ne.s32.totalorder %s665_s26, 0 }
 0x369   :  { %669 = shalt.err (%p946_p2)  }
 0x36a   :  { %671 = vsyncmov [#allocation3 + $0x7] }
 0x36d   :  { %s672_s6 = vpop.sfrf %671 }
 0x36e   :  { %p947_p12 = scmp.ne.s32.totalorder %s672_s6, 0 }
 0x370   :  { %676 = shalt.err (%p947_p12)  }
 0x371   :  { %678 = vsyncmov [#allocation3 + $0x8] }
 0x374   :  { %s679_s18 = vpop.sfrf %678 }
 0x375   :  { %p948_p8 = scmp.ne.s32.totalorder %s679_s18, 0 }
 0x377   :  { %683 = shalt.err (%p948_p8)  }
 0x378   :  { %685 = vsyncmov [#allocation3 + $0x9] }
 0x37b   :  { %s686_s29 = vpop.sfrf %685 }
 0x37c   :  { %p949_p5 = scmp.ne.s32.totalorder %s686_s29, 0 }
 0x37e   :  { %690 = shalt.err (%p949_p5)  }
 0x37f   :  { %692 = vsyncmov [#allocation3 + $0xa] }
 0x382   :  { %s693_s2 = vpop.sfrf %692 }
 0x383   :  { %p950_p13 = scmp.ne.s32.totalorder %s693_s2, 0 }
 0x385   :  { %697 = shalt.err (%p950_p13)  }
 0x386   :  { %699 = vsyncmov [#allocation3 + $0xb] }
 0x389   :  { %s700_s15 = vpop.sfrf %699 }
 0x38a   :  { %p951_p9 = scmp.ne.s32.totalorder %s700_s15, 0 }
 0x38c   :  { %704 = shalt.err (%p951_p9)  }
 0x38d   :  { %706 = vsyncmov [#allocation3 + $0xc] }
 0x390   :  { %s707_s19 = vpop.sfrf %706 }
 0x391   :  { %p952_p6 = scmp.ne.s32.totalorder %s707_s19, 0 }
 0x393   :  { %711 = shalt.err (%p952_p6)  }
 0x394   :  { %713 = vsyncmov [#allocation3 + $0xd] }
 0x397   :  { %s714_s30 = vpop.sfrf %713 }
 0x398   :  { %p953_p4 = scmp.ne.s32.totalorder %s714_s30, 0 }
 0x39a   :  { %718 = shalt.err (%p953_p4)  }
 0x39b   :  { %720 = vsyncmov [#allocation3 + $0xe] }
 0x39e   :  { %s721_s14 = vpop.sfrf %720 }
 0x39f   :  { %p954_p3 = scmp.ne.s32.totalorder %s721_s14, 0 }
 0x3a1   :  { %725 = shalt.err (%p954_p3)  }
 0x3a2   :  { %727 = vsyncmov [#allocation3 + $0xf] }
 0x3a5   :  { %s728_s0 = vpop.sfrf %727 }
 0x3a6   :  { %p955_p7 = scmp.ne.s32.totalorder %s728_s0, 0 }
 0x3a8   :  { %732 = shalt.err (%p955_p7)  }

</bundles_post_ra>
